<compile_context>
chip_gen: v5e
topology: v5e:2x2
jax: 0.10.0
libtpu: 0.0.40
codegen_flags: <defaults>
</compile_context>

<pallas_src>
import functools

import jax
import jax.numpy as jnp
from jax.experimental import pallas as pl
from jax.experimental.pallas import tpu as pltpu


# --------------------------------------------------------------------------- #
# tiling / hardware helpers
# --------------------------------------------------------------------------- #
def _pick_tile(n, cap, align):
    """Largest tile t <= cap with n % t == 0 and t % align == 0; else full n."""
    if n <= cap:
        return n
    t = (min(cap, n) // align) * align
    while t >= align:
        if n % t == 0:
            return t
        t -= align
    return n


def _row_tile(n):
    """Pass-1 row tile: multiple of 8 dividing n, sized for >= ~4 grid steps
    so the pipeline overlaps and the 'parallel' axis can shard across the two
    v7x TensorCores (grid=(1,) would idle half the chip)."""
    if n < 32:
        return n
    cap = min(1024, max(8, (n // 4) // 8 * 8))
    return _pick_tile(n, cap, 8)


def _vmem_limit_bytes(frac=0.85, fallback=64 * 1024 * 1024):
    """~85% of the physical per-core VMEM (generation-aware): leaves headroom
    for double buffers / compiler scratch on v7x (64 MiB physical) while not
    wasting half of v5e/v6e's 128 MiB."""
    try:
        return int(pltpu.get_tpu_info().vmem_capacity_bytes * frac)
    except Exception:  # older JAX or no queryable device info
        return fallback


def _weight_spec(shape, index_map, single_buffer):
    """Resident-weight BlockSpec; single-buffered when supported (constant
    index_map => no need for double buffering, halves the weight footprint)."""
    if single_buffer:
        return pl.BlockSpec(shape, index_map, pipeline_mode=pl.Buffered(1))
    return pl.BlockSpec(shape, index_map)


# --------------------------------------------------------------------------- #
# pass 1: fused per-view MLP + row-normalized z + z_fusion
# --------------------------------------------------------------------------- #
def _mlp_fuse_kernel(x_ref, w1f_ref, b1f_ref, w2_ref, b2_ref,
                     z_ref, zn_ref, zfus_ref, *, nviews, hidden):
    """One row tile of x -> per-view z, row-normalized z, and z_fusion."""
    x = x_ref[...]                                         # (TM, F)
    # One wide matmul for all V first layers: (TM, F) @ (F, V*H).
    h_all = jnp.dot(x, w1f_ref[...], preferred_element_type=jnp.float32)
    h_all = jnp.maximum(h_all + b1f_ref[...], 0.0)         # ReLU, (TM, V*H)

    inv_v = 1.0 / nviews
    acc = jnp.zeros(zfus_ref.shape, jnp.float32)           # (TM, D)
    for v in range(nviews):                                # static unroll
        h = h_all[:, v * hidden:(v + 1) * hidden]          # (TM, H) static slice
        z = jnp.dot(h, w2_ref[v], preferred_element_type=jnp.float32) + b2_ref[v]
        z_ref[v] = z
        # Pre-normalize rows so pass 2 is a plain Gram matmul (EUP rsqrt).
        inv_n = jax.lax.rsqrt(jnp.sum(z * z, axis=1, keepdims=True))
        zn_ref[v] = z * inv_n
        acc = acc + z * inv_v
    zfus_ref[...] = acc


def _pass1(xp, w1f, b1f, w2, b2, *, tm, nviews, hidden,
           vmem_limit, single_buffer_weights):
    n_pad, f_in = xp.shape
    d_out = w2.shape[2]
    vh = w1f.shape[1]
    const2 = lambda m: (0, 0)
    const3 = lambda m: (0, 0, 0)
    return pl.pallas_call(
        functools.partial(_mlp_fuse_kernel, nviews=nviews, hidden=hidden),
        out_shape=(
            jax.ShapeDtypeStruct((nviews, n_pad, d_out), jnp.float32),  # z
            jax.ShapeDtypeStruct((nviews, n_pad, d_out), jnp.float32),  # zn
            jax.ShapeDtypeStruct((n_pad, d_out), jnp.float32),          # z_fusion
        ),
        grid_spec=pltpu.PrefetchScalarGridSpec(
            num_scalar_prefetch=0,
            grid=(n_pad // tm,),
            in_specs=[
                pl.BlockSpec((tm, f_in), lambda m: (m, 0)),          # x row tile
                _weight_spec((f_in, vh), const2, single_buffer_weights),
                _weight_spec((1, vh), const2, single_buffer_weights),
                _weight_spec((nviews, hidden, d_out), const3, single_buffer_weights),
                _weight_spec((nviews, 1, d_out), const3, single_buffer_weights),
            ],
            out_specs=(
                pl.BlockSpec((nviews, tm, d_out), lambda m: (0, m, 0)),
                pl.BlockSpec((nviews, tm, d_out), lambda m: (0, m, 0)),
                pl.BlockSpec((tm, d_out), lambda m: (m, 0)),
            ),
        ),
        compiler_params=pltpu.CompilerParams(
            dimension_semantics=("parallel",),       # row tiles shard across TCs
            vmem_limit_bytes=vmem_limit),
    )(xp, w1f, b1f, w2, b2)


# --------------------------------------------------------------------------- #
# pass 2: tiled cosine similarity s_v = zn_v @ zn_v^T, zero diagonal
# --------------------------------------------------------------------------- #
def _sim_kernel(zn_ref, znt_ref, s_ref):
    """One (T, T) tile of s_v; zn_ref=(T,D) rows, znt_ref=(D,T) cols."""
    i = pl.program_id(1)
    j = pl.program_id(2)
    # Standard (T,D)@(D,T) contraction -- no per-step transpose needed.
    s = jnp.dot(zn_ref[...], znt_ref[...], preferred_element_type=jnp.float32)

    @pl.when(i != j)
    def _():
        s_ref[...] = s.astype(s_ref.dtype)

    @pl.when(i == j)          # diagonal masked only on the N/T diagonal tiles
    def _():
        r = jax.lax.broadcasted_iota(jnp.int32, s.shape, 0)
        c = jax.lax.broadcasted_iota(jnp.int32, s.shape, 1)
        s_ref[...] = jnp.where(r == c, 0.0, s).astype(s_ref.dtype)


def _pass2(zn, zn_t, *, ts, sim_dtype, vmem_limit):
    nviews, n_pad, d_out = zn.shape
    return pl.pallas_call(
        _sim_kernel,
        out_shape=jax.ShapeDtypeStruct((nviews, n_pad, n_pad), sim_dtype),
        grid_spec=pltpu.PrefetchScalarGridSpec(
            num_scalar_prefetch=0,
            grid=(nviews, n_pad // ts, n_pad // ts),
            in_specs=[
                pl.BlockSpec((None, ts, d_out), lambda v, i, j: (v, i, 0)),
                pl.BlockSpec((None, d_out, ts), lambda v, i, j: (v, 0, j)),
            ],
            out_specs=pl.BlockSpec((None, ts, ts), lambda v, i, j: (v, i, j)),
        ),
        compiler_params=pltpu.CompilerParams(
            dimension_semantics=("parallel", "parallel", "parallel"),
            vmem_limit_bytes=vmem_limit),
    )(zn, zn_t)


# --------------------------------------------------------------------------- #
# forward wrapper
# --------------------------------------------------------------------------- #
def cocomg_forward(x, w1, b1, w2, b2, *, sim_dtype=jnp.float32,
                   single_buffer_weights=True):
    """x: (N, F); w1: (V, F, H); b1: (V, 1, H); w2: (V, H, D); b2: (V, 1, D).
    Returns (z_all (V,N,D), s_all (V,N,N), z_fusion (N,D))."""
    n_nodes, f_in = x.shape
    nviews, _, hidden = w1.shape
    d_out = w2.shape[2]

    # Fuse the V first-layer weights: w1f[f, v*H + h] = w1[v, f, h].
    w1f = jnp.transpose(w1, (1, 0, 2)).reshape(f_in, nviews * hidden)
    b1f = b1.reshape(1, nviews * hidden)

    # Pad rows to a multiple of 8 so row tiles stay sublane-aligned for any N.
    pad = (-n_nodes) % 8
    xp = jnp.pad(x, ((0, pad), (0, 0))) if pad else x
    n_pad = n_nodes + pad

    tm = _row_tile(n_pad)                  # MLP row tile (>= ~4 grid steps)
    ts = _pick_tile(n_pad, 1024, 128)      # similarity tile (<= 1024, 128-aligned)
    vmem_limit = _vmem_limit_bytes()

    z_all, z_norm, z_fusion = _pass1(
        xp, w1f, b1f, w2, b2, tm=tm, nviews=nviews, hidden=hidden,
        vmem_limit=vmem_limit, single_buffer_weights=single_buffer_weights)

    # Lane-dense j-operand for pass 2: (V, D, N).  Wrapper-side transpose is
    # layout plumbing (2*V*N*D bytes) vs the V*N^2 similarity output.
    zn_t = jnp.swapaxes(z_norm, 1, 2)

    s_all = _pass2(z_norm, zn_t, ts=ts, sim_dtype=sim_dtype,
                   vmem_limit=vmem_limit)

    if pad:
        z_all = z_all[:, :n_nodes]
        s_all = s_all[:, :n_nodes, :n_nodes]
        z_fusion = z_fusion[:n_nodes]
    return z_all, s_all, z_fusion


# --------------------------------------------------------------------------- #
# reference + demo
# --------------------------------------------------------------------------- #
def _xavier_uniform(key, fan_in, fan_out):
    bound = jnp.sqrt(6.0 / (fan_in + fan_out))
    return jax.random.uniform(key, (fan_in, fan_out), jnp.float32, -bound, bound)


def _reference(x, w1, b1, w2, b2):
    """Pure-JAX reference mirroring the PyTorch forward (eval-mode dropout)."""
    nviews = w1.shape[0]
    z_list, s_list = [], []
    for v in range(nviews):
        h = jnp.maximum(x @ w1[v] + b1[v], 0.0)
        z = h @ w2[v] + b2[v]
        z_list.append(z)
        zz = z @ z.T
        nrm = jnp.sqrt(jnp.sum(z * z, axis=1, keepdims=True))
        dis = zz / (nrm * nrm.T)
        dis = dis * (1.0 - jnp.eye(z.shape[0], dtype=z.dtype))
        s_list.append(dis)
    z_fusion = jnp.mean(jnp.stack(z_list, 0), 0)
    return jnp.stack(z_list, 0), jnp.stack(s_list, 0), z_fusion


if __name__ == "__main__":
    # Small shapes: N nodes, n_in input feats, cfg = [H, D], view_num views.
    N, n_in, H, D, V = 64, 32, 32, 16, 2

    key = jax.random.PRNGKey(0)
    kx, k1, k2 = jax.random.split(key, 3)
    x = jax.random.normal(kx, (N, n_in), jnp.float32)

    # Deterministic xavier-uniform weights per view; biases zero (weights_init).
    w1 = jnp.stack([_xavier_uniform(jax.random.fold_in(k1, v), n_in, H)
                    for v in range(V)], 0)                       # (V, n_in, H)
    b1 = jnp.zeros((V, 1, H), jnp.float32)
    w2 = jnp.stack([_xavier_uniform(jax.random.fold_in(k2, v), H, D)
                    for v in range(V)], 0)                       # (V, H, D)
    b2 = jnp.zeros((V, 1, D), jnp.float32)

    fwd = jax.jit(functools.partial(cocomg_forward, single_buffer_weights=True))
    try:
        outs = fwd(x, w1, b1, w2, b2)
        jax.block_until_ready(outs)
    except Exception:
        # Fallback for JAX builds that reject pl.Buffered(1) single-buffering.
        fwd = jax.jit(functools.partial(cocomg_forward,
                                        single_buffer_weights=False))
        outs = fwd(x, w1, b1, w2, b2)
        jax.block_until_ready(outs)
    z_all, s_all, z_fusion = outs

    # Correctness check against pure-JAX reference.
    z_ref, s_ref, zf_ref = _reference(x, w1, b1, w2, b2)
    assert jnp.allclose(z_all, z_ref, atol=1e-4, rtol=1e-4)
    assert jnp.allclose(s_all, s_ref, atol=1e-4, rtol=1e-4)
    assert jnp.allclose(z_fusion, zf_ref, atol=1e-4, rtol=1e-4)

    # z_list / s_list per the PyTorch API would be [z_all[i] for i in range(V)].
    print("KERNEL_OK")
</pallas_src>

<mosaic_0001>
module attributes {stable_mosaic.version = 11 : i64} {
  func.func @_mlp_fuse_kernel(%arg0: i32, %arg1: memref<16x32xf32, #tpu.memory_space<vmem>>, %arg2: memref<32x64xf32, #tpu.memory_space<vmem>>, %arg3: memref<1x64xf32, #tpu.memory_space<vmem>>, %arg4: memref<2x32x16xf32, #tpu.memory_space<vmem>>, %arg5: memref<2x1x16xf32, #tpu.memory_space<vmem>>, %arg6: memref<2x16x16xf32, #tpu.memory_space<vmem>>, %arg7: memref<2x16x16xf32, #tpu.memory_space<vmem>>, %arg8: memref<16x16xf32, #tpu.memory_space<vmem>>) attributes {dimension_semantics = [#tpu.dimension_semantics<parallel>], iteration_bounds = array<i64: 4>, scalar_prefetch = 0 : i64, scratch_operands = 0 : i64, tpu.core_type = #tpu.core_type<tc>, window_params = [{transform_indices = @transform_0, window_bounds = array<i64: 16, 32>}, {pipeline_mode = #tpu.pipeline_mode<synchronous>, transform_indices = @transform_1, window_bounds = array<i64: 32, 64>}, {pipeline_mode = #tpu.pipeline_mode<synchronous>, transform_indices = @transform_2, window_bounds = array<i64: 1, 64>}, {pipeline_mode = #tpu.pipeline_mode<synchronous>, transform_indices = @transform_3, window_bounds = array<i64: 2, 32, 16>}, {pipeline_mode = #tpu.pipeline_mode<synchronous>, transform_indices = @transform_4, window_bounds = array<i64: 2, 1, 16>}, {transform_indices = @transform_5, window_bounds = array<i64: 2, 16, 16>}, {transform_indices = @transform_6, window_bounds = array<i64: 2, 16, 16>}, {transform_indices = @transform_7, window_bounds = array<i64: 16, 16>}]} {
    %c0 = arith.constant 0 : index
    %c0_0 = arith.constant 0 : index
    %0 = vector.load %arg1[%c0, %c0_0] : memref<16x32xf32, #tpu.memory_space<vmem>>, vector<16x32xf32>
    %c0_1 = arith.constant 0 : index
    %c0_2 = arith.constant 0 : index
    %1 = vector.load %arg2[%c0_1, %c0_2] : memref<32x64xf32, #tpu.memory_space<vmem>>, vector<32x64xf32>
    %cst = arith.constant dense<0.000000e+00> : vector<16x64xf32>
    %2 = tpu.matmul %0, %1, %cst {dimension_numbers = #tpu.dot_dimension_numbers<[1], [0], [0], [1], [0, 0, 1, 1], [], []>} : vector<16x32xf32>, vector<32x64xf32>, vector<16x64xf32> -> vector<16x64xf32>
    %c0_3 = arith.constant 0 : index
    %c0_4 = arith.constant 0 : index
    %3 = vector.load %arg3[%c0_3, %c0_4] : memref<1x64xf32, #tpu.memory_space<vmem>>, vector<1x64xf32>
    %4 = vector.broadcast %3 : vector<1x64xf32> to vector<16x64xf32>
    %5 = arith.addf %2, %4 : vector<16x64xf32>
    %cst_5 = arith.constant 0.000000e+00 : f32
    %6 = vector.broadcast %cst_5 : f32 to vector<16x64xf32>
    %7 = arith.maximumf %5, %6 : vector<16x64xf32>
    %cst_6 = arith.constant 0.000000e+00 : f32
    %8 = vector.broadcast %cst_6 : f32 to vector<16x16xf32>
    %9 = vector.extract_strided_slice %7 {offsets = [0, 0], sizes = [16, 32], strides = [1, 1]} : vector<16x64xf32> to vector<16x32xf32>
    %c0_7 = arith.constant 0 : index
    %c0_8 = arith.constant 0 : index
    %c0_9 = arith.constant 0 : index
    %10 = vector.load %arg4[%c0_7, %c0_8, %c0_9] : memref<2x32x16xf32, #tpu.memory_space<vmem>>, vector<1x32x16xf32>
    %11 = vector.shape_cast %10 : vector<1x32x16xf32> to vector<32x16xf32>
    %cst_10 = arith.constant dense<0.000000e+00> : vector<16x16xf32>
    %12 = tpu.matmul %9, %11, %cst_10 {dimension_numbers = #tpu.dot_dimension_numbers<[1], [0], [0], [1], [0, 0, 1, 1], [], []>} : vector<16x32xf32>, vector<32x16xf32>, vector<16x16xf32> -> vector<16x16xf32>
    %c0_11 = arith.constant 0 : index
    %c0_12 = arith.constant 0 : index
    %c0_13 = arith.constant 0 : index
    %13 = vector.load %arg5[%c0_11, %c0_12, %c0_13] : memref<2x1x16xf32, #tpu.memory_space<vmem>>, vector<1x1x16xf32>
    %14 = vector.shape_cast %13 : vector<1x1x16xf32> to vector<1x16xf32>
    %15 = vector.broadcast %14 : vector<1x16xf32> to vector<16x16xf32>
    %16 = arith.addf %12, %15 : vector<16x16xf32>
    %c0_14 = arith.constant 0 : index
    %c0_15 = arith.constant 0 : index
    %c0_16 = arith.constant 0 : index
    %17 = vector.load %arg6[%c0_14, %c0_15, %c0_16] : memref<2x16x16xf32, #tpu.memory_space<vmem>>, vector<1x16x16xf32>
    %18 = vector.shape_cast %17 : vector<1x16x16xf32> to vector<16x16xf32>
    %19 = vector.shape_cast %16 : vector<16x16xf32> to vector<1x16x16xf32>
    tpu.vector_store %arg6[%c0_14, %c0_15, %c0_16], %19 {strides = array<i32>} : memref<2x16x16xf32, #tpu.memory_space<vmem>>, vector<1x16x16xf32>,
    %20 = arith.mulf %16, %16 : vector<16x16xf32>
    %cst_17 = arith.constant dense<0.000000e+00> : vector<16xf32>
    %21 = vector.multi_reduction <add>, %20, %cst_17 [1] : vector<16x16xf32> to vector<16xf32>
    %22 = vector.shape_cast %21 : vector<16xf32> to vector<16x1xf32>
    %23 = math.rsqrt %22 : vector<16x1xf32>
    %24 = vector.broadcast %23 : vector<16x1xf32> to vector<16x16xf32>
    %25 = arith.mulf %16, %24 : vector<16x16xf32>
    %c0_18 = arith.constant 0 : index
    %c0_19 = arith.constant 0 : index
    %c0_20 = arith.constant 0 : index
    %26 = vector.load %arg7[%c0_18, %c0_19, %c0_20] : memref<2x16x16xf32, #tpu.memory_space<vmem>>, vector<1x16x16xf32>
    %27 = vector.shape_cast %26 : vector<1x16x16xf32> to vector<16x16xf32>
    %28 = vector.shape_cast %25 : vector<16x16xf32> to vector<1x16x16xf32>
    tpu.vector_store %arg7[%c0_18, %c0_19, %c0_20], %28 {strides = array<i32>} : memref<2x16x16xf32, #tpu.memory_space<vmem>>, vector<1x16x16xf32>,
    %cst_21 = arith.constant 5.000000e-01 : f32
    %29 = vector.broadcast %cst_21 : f32 to vector<16x16xf32>
    %30 = arith.mulf %16, %29 : vector<16x16xf32>
    %31 = arith.addf %8, %30 : vector<16x16xf32>
    %32 = vector.extract_strided_slice %7 {offsets = [0, 32], sizes = [16, 32], strides = [1, 1]} : vector<16x64xf32> to vector<16x32xf32>
    %c1 = arith.constant 1 : index
    %c0_22 = arith.constant 0 : index
    %c0_23 = arith.constant 0 : index
    %33 = vector.load %arg4[%c1, %c0_22, %c0_23] : memref<2x32x16xf32, #tpu.memory_space<vmem>>, vector<1x32x16xf32>
    %34 = vector.shape_cast %33 : vector<1x32x16xf32> to vector<32x16xf32>
    %cst_24 = arith.constant dense<0.000000e+00> : vector<16x16xf32>
    %35 = tpu.matmul %32, %34, %cst_24 {dimension_numbers = #tpu.dot_dimension_numbers<[1], [0], [0], [1], [0, 0, 1, 1], [], []>} : vector<16x32xf32>, vector<32x16xf32>, vector<16x16xf32> -> vector<16x16xf32>
    %c1_25 = arith.constant 1 : index
    %c0_26 = arith.constant 0 : index
    %c0_27 = arith.constant 0 : index
    %36 = vector.load %arg5[%c1_25, %c0_26, %c0_27] : memref<2x1x16xf32, #tpu.memory_space<vmem>>, vector<1x1x16xf32>
    %37 = vector.shape_cast %36 : vector<1x1x16xf32> to vector<1x16xf32>
    %38 = vector.broadcast %37 : vector<1x16xf32> to vector<16x16xf32>
    %39 = arith.addf %35, %38 : vector<16x16xf32>
    %c1_28 = arith.constant 1 : index
    %c0_29 = arith.constant 0 : index
    %c0_30 = arith.constant 0 : index
    %40 = vector.load %arg6[%c1_28, %c0_29, %c0_30] : memref<2x16x16xf32, #tpu.memory_space<vmem>>, vector<1x16x16xf32>
    %41 = vector.shape_cast %40 : vector<1x16x16xf32> to vector<16x16xf32>
    %42 = vector.shape_cast %39 : vector<16x16xf32> to vector<1x16x16xf32>
    tpu.vector_store %arg6[%c1_28, %c0_29, %c0_30], %42 {strides = array<i32>} : memref<2x16x16xf32, #tpu.memory_space<vmem>>, vector<1x16x16xf32>,
    %43 = arith.mulf %39, %39 : vector<16x16xf32>
    %cst_31 = arith.constant dense<0.000000e+00> : vector<16xf32>
    %44 = vector.multi_reduction <add>, %43, %cst_31 [1] : vector<16x16xf32> to vector<16xf32>
    %45 = vector.shape_cast %44 : vector<16xf32> to vector<16x1xf32>
    %46 = math.rsqrt %45 : vector<16x1xf32>
    %47 = vector.broadcast %46 : vector<16x1xf32> to vector<16x16xf32>
    %48 = arith.mulf %39, %47 : vector<16x16xf32>
    %c1_32 = arith.constant 1 : index
    %c0_33 = arith.constant 0 : index
    %c0_34 = arith.constant 0 : index
    %49 = vector.load %arg7[%c1_32, %c0_33, %c0_34] : memref<2x16x16xf32, #tpu.memory_space<vmem>>, vector<1x16x16xf32>
    %50 = vector.shape_cast %49 : vector<1x16x16xf32> to vector<16x16xf32>
    %51 = vector.shape_cast %48 : vector<16x16xf32> to vector<1x16x16xf32>
    tpu.vector_store %arg7[%c1_32, %c0_33, %c0_34], %51 {strides = array<i32>} : memref<2x16x16xf32, #tpu.memory_space<vmem>>, vector<1x16x16xf32>,
    %cst_35 = arith.constant 5.000000e-01 : f32
    %52 = vector.broadcast %cst_35 : f32 to vector<16x16xf32>
    %53 = arith.mulf %39, %52 : vector<16x16xf32>
    %54 = arith.addf %31, %53 : vector<16x16xf32>
    %c0_36 = arith.constant 0 : index
    %c0_37 = arith.constant 0 : index
    %55 = vector.load %arg8[%c0_36, %c0_37] : memref<16x16xf32, #tpu.memory_space<vmem>>, vector<16x16xf32>
    tpu.vector_store %arg8[%c0_36, %c0_37], %54 {strides = array<i32>} : memref<16x16xf32, #tpu.memory_space<vmem>>, vector<16x16xf32>,
    return
  }
  func.func @transform_0(%arg0: i32) -> (i32, i32) {
    %c0_i32 = arith.constant 0 : i32
    %c0_i32_0 = arith.constant 0 : i32
    return %arg0, %c0_i32 : i32, i32
  }
  func.func @transform_1(%arg0: i32) -> (i32, i32) {
    %c0_i32 = arith.constant 0 : i32
    %c0_i32_0 = arith.constant 0 : i32
    %c0_i32_1 = arith.constant 0 : i32
    return %c0_i32, %c0_i32_0 : i32, i32
  }
  func.func @transform_2(%arg0: i32) -> (i32, i32) {
    %c0_i32 = arith.constant 0 : i32
    %c0_i32_0 = arith.constant 0 : i32
    %c0_i32_1 = arith.constant 0 : i32
    return %c0_i32, %c0_i32_0 : i32, i32
  }
  func.func @transform_3(%arg0: i32) -> (i32, i32, i32) {
    %c0_i32 = arith.constant 0 : i32
    %c0_i32_0 = arith.constant 0 : i32
    %c0_i32_1 = arith.constant 0 : i32
    %c0_i32_2 = arith.constant 0 : i32
    return %c0_i32, %c0_i32_0, %c0_i32_1 : i32, i32, i32
  }
  func.func @transform_4(%arg0: i32) -> (i32, i32, i32) {
    %c0_i32 = arith.constant 0 : i32
    %c0_i32_0 = arith.constant 0 : i32
    %c0_i32_1 = arith.constant 0 : i32
    %c0_i32_2 = arith.constant 0 : i32
    return %c0_i32, %c0_i32_0, %c0_i32_1 : i32, i32, i32
  }
  func.func @transform_5(%arg0: i32) -> (i32, i32, i32) {
    %c0_i32 = arith.constant 0 : i32
    %c0_i32_0 = arith.constant 0 : i32
    %c0_i32_1 = arith.constant 0 : i32
    return %c0_i32, %arg0, %c0_i32_0 : i32, i32, i32
  }
  func.func @transform_6(%arg0: i32) -> (i32, i32, i32) {
    %c0_i32 = arith.constant 0 : i32
    %c0_i32_0 = arith.constant 0 : i32
    %c0_i32_1 = arith.constant 0 : i32
    return %c0_i32, %arg0, %c0_i32_0 : i32, i32, i32
  }
  func.func @transform_7(%arg0: i32) -> (i32, i32) {
    %c0_i32 = arith.constant 0 : i32
    %c0_i32_0 = arith.constant 0 : i32
    return %arg0, %c0_i32 : i32, i32
  }
}

module attributes {stable_mosaic.version = 11 : i64} {
  func.func @_sim_kernel(%arg0: i32, %arg1: i32, %arg2: i32, %arg3: memref<1x64x16xf32, #tpu.memory_space<vmem>>, %arg4: memref<1x16x64xf32, #tpu.memory_space<vmem>>, %arg5: memref<1x64x64xf32, #tpu.memory_space<vmem>>) attributes {dimension_semantics = [#tpu.dimension_semantics<parallel>, #tpu.dimension_semantics<parallel>, #tpu.dimension_semantics<parallel>], iteration_bounds = array<i64: 2, 1, 1>, scalar_prefetch = 0 : i64, scratch_operands = 0 : i64, tpu.core_type = #tpu.core_type<tc>, window_params = [{transform_indices = @transform_0, window_bounds = array<i64: 1, 64, 16>}, {transform_indices = @transform_1, window_bounds = array<i64: 1, 16, 64>}, {transform_indices = @transform_2, window_bounds = array<i64: 1, 64, 64>}]} {
    %c0 = arith.constant 0 : index
    %c0_0 = arith.constant 0 : index
    %c0_1 = arith.constant 0 : index
    %0 = vector.load %arg3[%c0, %c0_0, %c0_1] : memref<1x64x16xf32, #tpu.memory_space<vmem>>, vector<1x64x16xf32>
    %1 = vector.shape_cast %0 : vector<1x64x16xf32> to vector<64x16xf32>
    %c0_2 = arith.constant 0 : index
    %c0_3 = arith.constant 0 : index
    %c0_4 = arith.constant 0 : index
    %2 = vector.load %arg4[%c0_2, %c0_3, %c0_4] : memref<1x16x64xf32, #tpu.memory_space<vmem>>, vector<1x16x64xf32>
    %3 = vector.shape_cast %2 : vector<1x16x64xf32> to vector<16x64xf32>
    %cst = arith.constant dense<0.000000e+00> : vector<64x64xf32>
    %4 = tpu.matmul %1, %3, %cst {dimension_numbers = #tpu.dot_dimension_numbers<[1], [0], [0], [1], [0, 0, 1, 1], [], []>} : vector<64x16xf32>, vector<16x64xf32>, vector<64x64xf32> -> vector<64x64xf32>
    %5 = arith.cmpi ne, %arg1, %arg2 : i32
    %6 = arith.extui %5 : i1 to i32
    %c0_i32 = arith.constant 0 : i32
    %7 = arith.cmpi ne, %6, %c0_i32 : i32
    scf.if %7 {
      %c0_6 = arith.constant 0 : index
      %c0_7 = arith.constant 0 : index
      %c0_8 = arith.constant 0 : index
      %11 = vector.load %arg5[%c0_6, %c0_7, %c0_8] : memref<1x64x64xf32, #tpu.memory_space<vmem>>, vector<1x64x64xf32>
      %12 = vector.shape_cast %11 : vector<1x64x64xf32> to vector<64x64xf32>
      %13 = vector.shape_cast %4 : vector<64x64xf32> to vector<1x64x64xf32>
      tpu.vector_store %arg5[%c0_6, %c0_7, %c0_8], %13 {strides = array<i32>} : memref<1x64x64xf32, #tpu.memory_space<vmem>>, vector<1x64x64xf32>,
    } else {
    }
    %8 = arith.cmpi eq, %arg1, %arg2 : i32
    %9 = arith.extui %8 : i1 to i32
    %c0_i32_5 = arith.constant 0 : i32
    %10 = arith.cmpi ne, %9, %c0_i32_5 : i32
    scf.if %10 {
      %11 = tpu.iota {dimensions = array<i32: 0>} : vector<64x64xi32>
      %12 = tpu.iota {dimensions = array<i32: 1>} : vector<64x64xi32>
      %13 = arith.cmpi eq, %11, %12 : vector<64x64xi32>
      %cst_6 = arith.constant 0.000000e+00 : f32
      %14 = vector.broadcast %cst_6 : f32 to vector<64x64xf32>
      %15 = arith.select %13, %14, %4 : vector<64x64xi1>, vector<64x64xf32>
      %c0_7 = arith.constant 0 : index
      %c0_8 = arith.constant 0 : index
      %c0_9 = arith.constant 0 : index
      %16 = vector.load %arg5[%c0_7, %c0_8, %c0_9] : memref<1x64x64xf32, #tpu.memory_space<vmem>>, vector<1x64x64xf32>
      %17 = vector.shape_cast %16 : vector<1x64x64xf32> to vector<64x64xf32>
      %18 = vector.shape_cast %15 : vector<64x64xf32> to vector<1x64x64xf32>
      tpu.vector_store %arg5[%c0_7, %c0_8, %c0_9], %18 {strides = array<i32>} : memref<1x64x64xf32, #tpu.memory_space<vmem>>, vector<1x64x64xf32>,
    } else {
    }
    return
  }
  func.func @transform_0(%arg0: i32, %arg1: i32, %arg2: i32) -> (i32, i32, i32) {
    %c0_i32 = arith.constant 0 : i32
    %c0_i32_0 = arith.constant 0 : i32
    return %arg0, %arg1, %c0_i32 : i32, i32, i32
  }
  func.func @transform_1(%arg0: i32, %arg1: i32, %arg2: i32) -> (i32, i32, i32) {
    %c0_i32 = arith.constant 0 : i32
    %c0_i32_0 = arith.constant 0 : i32
    return %arg0, %c0_i32, %arg2 : i32, i32, i32
  }
  func.func @transform_2(%arg0: i32, %arg1: i32, %arg2: i32) -> (i32, i32, i32) {
    %c0_i32 = arith.constant 0 : i32
    return %arg0, %arg1, %arg2 : i32, i32, i32
  }
}

module attributes {stable_mosaic.version = 11 : i64} {
  func.func @_mlp_fuse_kernel(%arg0: i32, %arg1: memref<16x32xf32, #tpu.memory_space<vmem>>, %arg2: memref<32x64xf32, #tpu.memory_space<vmem>>, %arg3: memref<1x64xf32, #tpu.memory_space<vmem>>, %arg4: memref<2x32x16xf32, #tpu.memory_space<vmem>>, %arg5: memref<2x1x16xf32, #tpu.memory_space<vmem>>, %arg6: memref<2x16x16xf32, #tpu.memory_space<vmem>>, %arg7: memref<2x16x16xf32, #tpu.memory_space<vmem>>, %arg8: memref<16x16xf32, #tpu.memory_space<vmem>>) attributes {dimension_semantics = [#tpu.dimension_semantics<parallel>], iteration_bounds = array<i64: 4>, scalar_prefetch = 0 : i64, scratch_operands = 0 : i64, tpu.core_type = #tpu.core_type<tc>, window_params = [{transform_indices = @transform_0, window_bounds = array<i64: 16, 32>}, {pipeline_mode = #tpu.pipeline_mode<synchronous>, transform_indices = @transform_1, window_bounds = array<i64: 32, 64>}, {pipeline_mode = #tpu.pipeline_mode<synchronous>, transform_indices = @transform_2, window_bounds = array<i64: 1, 64>}, {pipeline_mode = #tpu.pipeline_mode<synchronous>, transform_indices = @transform_3, window_bounds = array<i64: 2, 32, 16>}, {pipeline_mode = #tpu.pipeline_mode<synchronous>, transform_indices = @transform_4, window_bounds = array<i64: 2, 1, 16>}, {transform_indices = @transform_5, window_bounds = array<i64: 2, 16, 16>}, {transform_indices = @transform_6, window_bounds = array<i64: 2, 16, 16>}, {transform_indices = @transform_7, window_bounds = array<i64: 16, 16>}]} {
    %c0 = arith.constant 0 : index
    %c0_0 = arith.constant 0 : index
    %0 = vector.load %arg1[%c0, %c0_0] : memref<16x32xf32, #tpu.memory_space<vmem>>, vector<16x32xf32>
    %c0_1 = arith.constant 0 : index
    %c0_2 = arith.constant 0 : index
    %1 = vector.load %arg2[%c0_1, %c0_2] : memref<32x64xf32, #tpu.memory_space<vmem>>, vector<32x64xf32>
    %cst = arith.constant dense<0.000000e+00> : vector<16x64xf32>
    %2 = tpu.matmul %0, %1, %cst {dimension_numbers = #tpu.dot_dimension_numbers<[1], [0], [0], [1], [0, 0, 1, 1], [], []>} : vector<16x32xf32>, vector<32x64xf32>, vector<16x64xf32> -> vector<16x64xf32>
    %c0_3 = arith.constant 0 : index
    %c0_4 = arith.constant 0 : index
    %3 = vector.load %arg3[%c0_3, %c0_4] : memref<1x64xf32, #tpu.memory_space<vmem>>, vector<1x64xf32>
    %4 = vector.broadcast %3 : vector<1x64xf32> to vector<16x64xf32>
    %5 = arith.addf %2, %4 : vector<16x64xf32>
    %cst_5 = arith.constant 0.000000e+00 : f32
    %6 = vector.broadcast %cst_5 : f32 to vector<16x64xf32>
    %7 = arith.maximumf %5, %6 : vector<16x64xf32>
    %cst_6 = arith.constant 0.000000e+00 : f32
    %8 = vector.broadcast %cst_6 : f32 to vector<16x16xf32>
    %9 = vector.extract_strided_slice %7 {offsets = [0, 0], sizes = [16, 32], strides = [1, 1]} : vector<16x64xf32> to vector<16x32xf32>
    %c0_7 = arith.constant 0 : index
    %c0_8 = arith.constant 0 : index
    %c0_9 = arith.constant 0 : index
    %10 = vector.load %arg4[%c0_7, %c0_8, %c0_9] : memref<2x32x16xf32, #tpu.memory_space<vmem>>, vector<1x32x16xf32>
    %11 = vector.shape_cast %10 : vector<1x32x16xf32> to vector<32x16xf32>
    %cst_10 = arith.constant dense<0.000000e+00> : vector<16x16xf32>
    %12 = tpu.matmul %9, %11, %cst_10 {dimension_numbers = #tpu.dot_dimension_numbers<[1], [0], [0], [1], [0, 0, 1, 1], [], []>} : vector<16x32xf32>, vector<32x16xf32>, vector<16x16xf32> -> vector<16x16xf32>
    %c0_11 = arith.constant 0 : index
    %c0_12 = arith.constant 0 : index
    %c0_13 = arith.constant 0 : index
    %13 = vector.load %arg5[%c0_11, %c0_12, %c0_13] : memref<2x1x16xf32, #tpu.memory_space<vmem>>, vector<1x1x16xf32>
    %14 = vector.shape_cast %13 : vector<1x1x16xf32> to vector<1x16xf32>
    %15 = vector.broadcast %14 : vector<1x16xf32> to vector<16x16xf32>
    %16 = arith.addf %12, %15 : vector<16x16xf32>
    %c0_14 = arith.constant 0 : index
    %c0_15 = arith.constant 0 : index
    %c0_16 = arith.constant 0 : index
    %17 = vector.load %arg6[%c0_14, %c0_15, %c0_16] : memref<2x16x16xf32, #tpu.memory_space<vmem>>, vector<1x16x16xf32>
    %18 = vector.shape_cast %17 : vector<1x16x16xf32> to vector<16x16xf32>
    %19 = vector.shape_cast %16 : vector<16x16xf32> to vector<1x16x16xf32>
    tpu.vector_store %arg6[%c0_14, %c0_15, %c0_16], %19 {strides = array<i32>} : memref<2x16x16xf32, #tpu.memory_space<vmem>>, vector<1x16x16xf32>,
    %20 = arith.mulf %16, %16 : vector<16x16xf32>
    %cst_17 = arith.constant dense<0.000000e+00> : vector<16xf32>
    %21 = vector.multi_reduction <add>, %20, %cst_17 [1] : vector<16x16xf32> to vector<16xf32>
    %22 = vector.shape_cast %21 : vector<16xf32> to vector<16x1xf32>
    %23 = math.rsqrt %22 : vector<16x1xf32>
    %24 = vector.broadcast %23 : vector<16x1xf32> to vector<16x16xf32>
    %25 = arith.mulf %16, %24 : vector<16x16xf32>
    %c0_18 = arith.constant 0 : index
    %c0_19 = arith.constant 0 : index
    %c0_20 = arith.constant 0 : index
    %26 = vector.load %arg7[%c0_18, %c0_19, %c0_20] : memref<2x16x16xf32, #tpu.memory_space<vmem>>, vector<1x16x16xf32>
    %27 = vector.shape_cast %26 : vector<1x16x16xf32> to vector<16x16xf32>
    %28 = vector.shape_cast %25 : vector<16x16xf32> to vector<1x16x16xf32>
    tpu.vector_store %arg7[%c0_18, %c0_19, %c0_20], %28 {strides = array<i32>} : memref<2x16x16xf32, #tpu.memory_space<vmem>>, vector<1x16x16xf32>,
    %cst_21 = arith.constant 5.000000e-01 : f32
    %29 = vector.broadcast %cst_21 : f32 to vector<16x16xf32>
    %30 = arith.mulf %16, %29 : vector<16x16xf32>
    %31 = arith.addf %8, %30 : vector<16x16xf32>
    %32 = vector.extract_strided_slice %7 {offsets = [0, 32], sizes = [16, 32], strides = [1, 1]} : vector<16x64xf32> to vector<16x32xf32>
    %c1 = arith.constant 1 : index
    %c0_22 = arith.constant 0 : index
    %c0_23 = arith.constant 0 : index
    %33 = vector.load %arg4[%c1, %c0_22, %c0_23] : memref<2x32x16xf32, #tpu.memory_space<vmem>>, vector<1x32x16xf32>
    %34 = vector.shape_cast %33 : vector<1x32x16xf32> to vector<32x16xf32>
    %cst_24 = arith.constant dense<0.000000e+00> : vector<16x16xf32>
    %35 = tpu.matmul %32, %34, %cst_24 {dimension_numbers = #tpu.dot_dimension_numbers<[1], [0], [0], [1], [0, 0, 1, 1], [], []>} : vector<16x32xf32>, vector<32x16xf32>, vector<16x16xf32> -> vector<16x16xf32>
    %c1_25 = arith.constant 1 : index
    %c0_26 = arith.constant 0 : index
    %c0_27 = arith.constant 0 : index
    %36 = vector.load %arg5[%c1_25, %c0_26, %c0_27] : memref<2x1x16xf32, #tpu.memory_space<vmem>>, vector<1x1x16xf32>
    %37 = vector.shape_cast %36 : vector<1x1x16xf32> to vector<1x16xf32>
    %38 = vector.broadcast %37 : vector<1x16xf32> to vector<16x16xf32>
    %39 = arith.addf %35, %38 : vector<16x16xf32>
    %c1_28 = arith.constant 1 : index
    %c0_29 = arith.constant 0 : index
    %c0_30 = arith.constant 0 : index
    %40 = vector.load %arg6[%c1_28, %c0_29, %c0_30] : memref<2x16x16xf32, #tpu.memory_space<vmem>>, vector<1x16x16xf32>
    %41 = vector.shape_cast %40 : vector<1x16x16xf32> to vector<16x16xf32>
    %42 = vector.shape_cast %39 : vector<16x16xf32> to vector<1x16x16xf32>
    tpu.vector_store %arg6[%c1_28, %c0_29, %c0_30], %42 {strides = array<i32>} : memref<2x16x16xf32, #tpu.memory_space<vmem>>, vector<1x16x16xf32>,
    %43 = arith.mulf %39, %39 : vector<16x16xf32>
    %cst_31 = arith.constant dense<0.000000e+00> : vector<16xf32>
    %44 = vector.multi_reduction <add>, %43, %cst_31 [1] : vector<16x16xf32> to vector<16xf32>
    %45 = vector.shape_cast %44 : vector<16xf32> to vector<16x1xf32>
    %46 = math.rsqrt %45 : vector<16x1xf32>
    %47 = vector.broadcast %46 : vector<16x1xf32> to vector<16x16xf32>
    %48 = arith.mulf %39, %47 : vector<16x16xf32>
    %c1_32 = arith.constant 1 : index
    %c0_33 = arith.constant 0 : index
    %c0_34 = arith.constant 0 : index
    %49 = vector.load %arg7[%c1_32, %c0_33, %c0_34] : memref<2x16x16xf32, #tpu.memory_space<vmem>>, vector<1x16x16xf32>
    %50 = vector.shape_cast %49 : vector<1x16x16xf32> to vector<16x16xf32>
    %51 = vector.shape_cast %48 : vector<16x16xf32> to vector<1x16x16xf32>
    tpu.vector_store %arg7[%c1_32, %c0_33, %c0_34], %51 {strides = array<i32>} : memref<2x16x16xf32, #tpu.memory_space<vmem>>, vector<1x16x16xf32>,
    %cst_35 = arith.constant 5.000000e-01 : f32
    %52 = vector.broadcast %cst_35 : f32 to vector<16x16xf32>
    %53 = arith.mulf %39, %52 : vector<16x16xf32>
    %54 = arith.addf %31, %53 : vector<16x16xf32>
    %c0_36 = arith.constant 0 : index
    %c0_37 = arith.constant 0 : index
    %55 = vector.load %arg8[%c0_36, %c0_37] : memref<16x16xf32, #tpu.memory_space<vmem>>, vector<16x16xf32>
    tpu.vector_store %arg8[%c0_36, %c0_37], %54 {strides = array<i32>} : memref<16x16xf32, #tpu.memory_space<vmem>>, vector<16x16xf32>,
    return
  }
  func.func @transform_0(%arg0: i32) -> (i32, i32) {
    %c0_i32 = arith.constant 0 : i32
    %c0_i32_0 = arith.constant 0 : i32
    return %arg0, %c0_i32 : i32, i32
  }
  func.func @transform_1(%arg0: i32) -> (i32, i32) {
    %c0_i32 = arith.constant 0 : i32
    %c0_i32_0 = arith.constant 0 : i32
    %c0_i32_1 = arith.constant 0 : i32
    return %c0_i32, %c0_i32_0 : i32, i32
  }
  func.func @transform_2(%arg0: i32) -> (i32, i32) {
    %c0_i32 = arith.constant 0 : i32
    %c0_i32_0 = arith.constant 0 : i32
    %c0_i32_1 = arith.constant 0 : i32
    return %c0_i32, %c0_i32_0 : i32, i32
  }
  func.func @transform_3(%arg0: i32) -> (i32, i32, i32) {
    %c0_i32 = arith.constant 0 : i32
    %c0_i32_0 = arith.constant 0 : i32
    %c0_i32_1 = arith.constant 0 : i32
    %c0_i32_2 = arith.constant 0 : i32
    return %c0_i32, %c0_i32_0, %c0_i32_1 : i32, i32, i32
  }
  func.func @transform_4(%arg0: i32) -> (i32, i32, i32) {
    %c0_i32 = arith.constant 0 : i32
    %c0_i32_0 = arith.constant 0 : i32
    %c0_i32_1 = arith.constant 0 : i32
    %c0_i32_2 = arith.constant 0 : i32
    return %c0_i32, %c0_i32_0, %c0_i32_1 : i32, i32, i32
  }
  func.func @transform_5(%arg0: i32) -> (i32, i32, i32) {
    %c0_i32 = arith.constant 0 : i32
    %c0_i32_0 = arith.constant 0 : i32
    %c0_i32_1 = arith.constant 0 : i32
    return %c0_i32, %arg0, %c0_i32_0 : i32, i32, i32
  }
  func.func @transform_6(%arg0: i32) -> (i32, i32, i32) {
    %c0_i32 = arith.constant 0 : i32
    %c0_i32_0 = arith.constant 0 : i32
    %c0_i32_1 = arith.constant 0 : i32
    return %c0_i32, %arg0, %c0_i32_0 : i32, i32, i32
  }
  func.func @transform_7(%arg0: i32) -> (i32, i32) {
    %c0_i32 = arith.constant 0 : i32
    %c0_i32_0 = arith.constant 0 : i32
    return %arg0, %c0_i32 : i32, i32
  }
}

module attributes {stable_mosaic.version = 11 : i64} {
  func.func @_sim_kernel(%arg0: i32, %arg1: i32, %arg2: i32, %arg3: memref<1x64x16xf32, #tpu.memory_space<vmem>>, %arg4: memref<1x16x64xf32, #tpu.memory_space<vmem>>, %arg5: memref<1x64x64xf32, #tpu.memory_space<vmem>>) attributes {dimension_semantics = [#tpu.dimension_semantics<parallel>, #tpu.dimension_semantics<parallel>, #tpu.dimension_semantics<parallel>], iteration_bounds = array<i64: 2, 1, 1>, scalar_prefetch = 0 : i64, scratch_operands = 0 : i64, tpu.core_type = #tpu.core_type<tc>, window_params = [{transform_indices = @transform_0, window_bounds = array<i64: 1, 64, 16>}, {transform_indices = @transform_1, window_bounds = array<i64: 1, 16, 64>}, {transform_indices = @transform_2, window_bounds = array<i64: 1, 64, 64>}]} {
    %c0 = arith.constant 0 : index
    %c0_0 = arith.constant 0 : index
    %c0_1 = arith.constant 0 : index
    %0 = vector.load %arg3[%c0, %c0_0, %c0_1] : memref<1x64x16xf32, #tpu.memory_space<vmem>>, vector<1x64x16xf32>
    %1 = vector.shape_cast %0 : vector<1x64x16xf32> to vector<64x16xf32>
    %c0_2 = arith.constant 0 : index
    %c0_3 = arith.constant 0 : index
    %c0_4 = arith.constant 0 : index
    %2 = vector.load %arg4[%c0_2, %c0_3, %c0_4] : memref<1x16x64xf32, #tpu.memory_space<vmem>>, vector<1x16x64xf32>
    %3 = vector.shape_cast %2 : vector<1x16x64xf32> to vector<16x64xf32>
    %cst = arith.constant dense<0.000000e+00> : vector<64x64xf32>
    %4 = tpu.matmul %1, %3, %cst {dimension_numbers = #tpu.dot_dimension_numbers<[1], [0], [0], [1], [0, 0, 1, 1], [], []>} : vector<64x16xf32>, vector<16x64xf32>, vector<64x64xf32> -> vector<64x64xf32>
    %5 = arith.cmpi ne, %arg1, %arg2 : i32
    %6 = arith.extui %5 : i1 to i32
    %c0_i32 = arith.constant 0 : i32
    %7 = arith.cmpi ne, %6, %c0_i32 : i32
    scf.if %7 {
      %c0_6 = arith.constant 0 : index
      %c0_7 = arith.constant 0 : index
      %c0_8 = arith.constant 0 : index
      %11 = vector.load %arg5[%c0_6, %c0_7, %c0_8] : memref<1x64x64xf32, #tpu.memory_space<vmem>>, vector<1x64x64xf32>
      %12 = vector.shape_cast %11 : vector<1x64x64xf32> to vector<64x64xf32>
      %13 = vector.shape_cast %4 : vector<64x64xf32> to vector<1x64x64xf32>
      tpu.vector_store %arg5[%c0_6, %c0_7, %c0_8], %13 {strides = array<i32>} : memref<1x64x64xf32, #tpu.memory_space<vmem>>, vector<1x64x64xf32>,
    } else {
    }
    %8 = arith.cmpi eq, %arg1, %arg2 : i32
    %9 = arith.extui %8 : i1 to i32
    %c0_i32_5 = arith.constant 0 : i32
    %10 = arith.cmpi ne, %9, %c0_i32_5 : i32
    scf.if %10 {
      %11 = tpu.iota {dimensions = array<i32: 0>} : vector<64x64xi32>
      %12 = tpu.iota {dimensions = array<i32: 1>} : vector<64x64xi32>
      %13 = arith.cmpi eq, %11, %12 : vector<64x64xi32>
      %cst_6 = arith.constant 0.000000e+00 : f32
      %14 = vector.broadcast %cst_6 : f32 to vector<64x64xf32>
      %15 = arith.select %13, %14, %4 : vector<64x64xi1>, vector<64x64xf32>
      %c0_7 = arith.constant 0 : index
      %c0_8 = arith.constant 0 : index
      %c0_9 = arith.constant 0 : index
      %16 = vector.load %arg5[%c0_7, %c0_8, %c0_9] : memref<1x64x64xf32, #tpu.memory_space<vmem>>, vector<1x64x64xf32>
      %17 = vector.shape_cast %16 : vector<1x64x64xf32> to vector<64x64xf32>
      %18 = vector.shape_cast %15 : vector<64x64xf32> to vector<1x64x64xf32>
      tpu.vector_store %arg5[%c0_7, %c0_8, %c0_9], %18 {strides = array<i32>} : memref<1x64x64xf32, #tpu.memory_space<vmem>>, vector<1x64x64xf32>,
    } else {
    }
    return
  }
  func.func @transform_0(%arg0: i32, %arg1: i32, %arg2: i32) -> (i32, i32, i32) {
    %c0_i32 = arith.constant 0 : i32
    %c0_i32_0 = arith.constant 0 : i32
    return %arg0, %arg1, %c0_i32 : i32, i32, i32
  }
  func.func @transform_1(%arg0: i32, %arg1: i32, %arg2: i32) -> (i32, i32, i32) {
    %c0_i32 = arith.constant 0 : i32
    %c0_i32_0 = arith.constant 0 : i32
    return %arg0, %c0_i32, %arg2 : i32, i32, i32
  }
  func.func @transform_2(%arg0: i32, %arg1: i32, %arg2: i32) -> (i32, i32, i32) {
    %c0_i32 = arith.constant 0 : i32
    return %arg0, %arg1, %arg2 : i32, i32, i32
  }
}

</mosaic_0001>

<bundles_post_ra>
// kernel: cocomg_forward.3
= control target key start
LH: loop header
LB: loop body
LE: loop exit
PB: predicated region body
PF: predicated region fallthrough
CT: control target
= control target key end

     0   :  { %7 = vsyncpa [#allocation3], 0  ;;  %s779_s0 = inlined_call_operand.vmem [shape: f32[2,64,16], index: 0, kind: input, shape index: {}]   ;;  %s780_s1 = inlined_call_operand.vmem [shape: f32[2,16,64], index: 1, kind: input, shape index: {}]   ;;  %s781_s2 = inlined_call_operand.hbm [shape: f32[2,64,64], index: 2, kind: output, shape index: {}]  }
   0x1   :  { %9 = vsyncpa [#allocation3 + $0x1], 0  ;;  %s648_s9 = smov 0   ;;  %s650_s10 = smov 0  }
   0x2   :  { %s652_s11 = smov 0   ;;  %s654_s12 = smov 0  }
   0x3   :  { %s656_s13 = smov 0   ;;  %s658_s14 = smov 0  }
   0x4 LB: > { %s462_s15 = sadd.s32 4294967295, %s629_s14   ;;  %s463_s16 = sadd.s32 4294967294, %s629_s14   ;;  %s629_s14 = sphi %s658_s14, %s15_s14   ;;  %s625_s13 = sphi %s656_s13, %s788_s13   ;;  %s621_s12 = sphi %s654_s12, %s787_s12   ;;  %s617_s11 = sphi %s652_s11, %s786_s11   ;;  %s613_s10 = sphi %s650_s10, %s785_s10   ;;  %s609_s9 = sphi %s648_s9, %s784_s9  }
   0x5   : > { %s34_s17 = sadd.s32 1, %s625_s13  ;;  %s101_s18 = sadd.s32 1, %s617_s11 }
   0x6   : > { %p36_p0 = scmp.ge.s32.totalorder %s34_s17, 2  ;;  %p111_p1 = scmp.ne.s32.totalorder %s617_s11, %s613_s10 }
   0x7   : > { %p112_p2 = scmp.eq.s32.totalorder %s462_s15, 1  ;;  %p117_p3 = scmp.ne.s32.totalorder %s613_s10, %s609_s9 }
   0x8   : > { %s790_s17 = smov (%p36_p0, %s34_s17), 0  ;;  %p118_p5 = scmp.eq.s32.totalorder %s463_s16, 1 }
   0x9   : > { %p688_p4 = por %p112_p2, %p111_p1  ;;  %s94_s20 = ssub.s32 %s625_s13, %s790_s17 }
   0xa   : > { %p466_p6 = scmp.ge.s32.totalorder %s629_s14, 1  ;;  %p99_p7 = scmp.eq.s32.totalorder %s94_s20, 0 }
   0xb   : > { %p695_p8 = por %p118_p5, %p117_p3  ;;  %p160_p9 = scmp.lt.s32.totalorder %s629_s14, 3 }
   0xc   : > { %s701_s22 = scalar_select %p99_p7, %s617_s11, %s101_s18  }
   0xd   : > { %p161_p10 = pnand %p466_p6, %p160_p9 }
   0xe   : > { %p195_p11 = scmp.lt.s32.totalorder (!%p161_p10), %s621_s12, 1  ;;  %s191_s4 = sand.u32 (!%p161_p10), 1, %s613_s10  }
   0xf   : > { %164 = sbr.rel (%p161_p10) target bundleno = 174 (0xae), region = 28  ;;  %s467_s5 = sshll.u32 (!%p161_p10), %s191_s4, 6 }
  0x10   : > { %s722_s6 = scalar_lea.vmem (!%p161_p10), [#allocation2], %s467_s5  ;;  %s487_s7 = sshll.u32 (!%p161_p10), %s621_s12, 6 }
  0x11   : > { %s357_s16 = scalar_lea.hbm (!%p161_p10), %s781_s2, %s487_s7  ;;  %s343_s20 = scalar_lea.sflag (!%p161_p10), [#allocation3], %s191_s4 }
  0x12   : > { %s360_s18 = sshll.u32 (!%p161_p10), %s357_s16, 4  ;;  %s571_s27 = scalar_lea.hbm (!%p161_p10), %s781_s2, 128  ;;  %s361_s18 = int_to_ptr.hbm [resolvable:$true] %s360_s18 }
  0x14   : > { %s196_s23 = scalar_select %p195_p11, %s621_s12, 1  ;;  %vm223_vm0 = vcmask 130048   ;;  %v306_v10 = vlaneseq  ;;  %vm333_vm3 = vcmask 523264  }
  0x15   : > { %s358_s12 = sshll.u32 %s722_s6, 4  ;;  %s359_s12 = int_to_ptr.vmem [resolvable:$true] %s358_s12 }
  0x16   : > { %s485_s24 = sshll.u32 %s196_s23, 6  ;;  %s486_s25 = sshll.u32 %s196_s23, 4  ;;  %v307_v11 = vshrl.u32 %v306_v10, 7  ;;  %v316_v12 = vand.u32 127, %v306_v10 }
  0x17   : > { %s202_s28 = scalar_lea.vmem %s779_s0, %s485_s24  ;;  %s211_s3 = scalar_lea.vmem %s780_s1, %s486_s25 }
  0x18   : > { %v222_v0 = vld [vmem:[%s211_s3 + $0x8] sm:$0xff]  ;;  %v221_v1 = vld [vmem:[%s211_s3] sm:$0xff]  ;;  %v219_v3 = vld [vmem:[%s202_s28 + $0x30] sm:$0xff]  ;;  %v309_v13 = vadd.s32 16, %v307_v11  ;;  %vm317_vm1 = vcmp.eq.s32.totalorder %v307_v11, %v316_v12  ;;  %v311_v14 = vadd.s32 32, %v307_v11  ;;  %v313_v15 = vadd.s32 48, %v307_v11 }
  0x19   : > { %489 = vmatpush.msra.mxu2 %v222_v0  ;;  %490 = vmatpush.msra.mxu3 %v222_v0  ;;  %v217_v2 = vld [vmem:[%s202_s28 + $0x20] sm:$0xff]  ;;  %v215_v5 = vld [vmem:[%s202_s28 + $0x10] sm:$0xff]  ;;  %v218_v6 = vld [vmem:[%s202_s28 + $0x28] sm:$0xff]  ;;  %v308_v20 = vadd.s32 8, %v307_v11  ;;  %v310_v21 = vadd.s32 24, %v307_v11  ;;  %v312_v26 = vadd.s32 40, %v307_v11 }
  0x1a   : > { %262 = vmatpush.msra.mxu0 %v222_v0  ;;  %488 = vmatpush.msra.mxu1 %v222_v0  ;;  %v213_v4 = vld [vmem:[%s202_s28] sm:$0xff]  ;;  %v220_v7 = vld [vmem:[%s202_s28 + $0x38] sm:$0xff]  ;;  %v214_v8 = vld [vmem:[%s202_s28 + $0x8] sm:$0xff]  ;;  %vm319_vm2 = vcmp.eq.s32.totalorder %v309_v13, %v316_v12  ;;  %vm321_vm4 = vcmp.eq.s32.totalorder %v311_v14, %v316_v12  ;;  %vm323_vm5 = vcmp.eq.s32.totalorder %v313_v15, %v316_v12  ;;  %v314_v27 = vadd.s32 56, %v307_v11  ;;  %s565_s23 = sshra.s32 %s361_s18, 4  ;;  %s566_s23 = int_to_ptr.hbm [resolvable:$true] %s565_s23 }
  0x1b   : > { %492 = vmatpush.msra.mxu2 %v221_v1  ;;  %493 = vmatpush.msra.mxu3 %v221_v1  ;;  %v216_v9 = vld [vmem:[%s202_s28 + $0x18] sm:$0xff]  ;;  %vm318_vm6 = vcmp.eq.s32.totalorder %v308_v20, %v316_v12  ;;  %vm320_vm7 = vcmp.eq.s32.totalorder %v310_v21, %v316_v12  ;;  %vm322_vm8 = vcmp.eq.s32.totalorder %v312_v26, %v316_v12  ;;  %s567_s24 = scalar_lea.hbm %s566_s23, 64  ;;  %p572_p1 = scmp.lt.s32.totalorder %s566_s23, %s781_s2 }
  0x1c   : > { %476 = vmatmul.msk.f32.vlgmr.msra.gmra.mxu2 %vm223_vm0, %v217_v2  ;;  %478 = vmatmul.msk.f32.vlgmr.msra.gmra.mxu3 %vm223_vm0, %v219_v3  ;;  %vm324_vm9 = vcmp.eq.s32.totalorder %v314_v27, %v316_v12  ;;  %p568_p12 = scmp.ne.s32.totalorder %s566_s23, %s567_s24  ;;  %p573_p2 = scmp.lt.s32.totalorder %s571_s27, %s567_s24 }
  0x1d   : > { %263 = vmatpush.msra.mxu0 %v221_v1  ;;  %491 = vmatpush.msra.mxu1 %v221_v1 }
  0x1e   : > { %472 = vmatmul.msk.f32.vlgmr.msra.gmra.mxu0 %vm223_vm0, %v213_v4  ;;  %474 = vmatmul.msk.f32.vlgmr.msra.gmra.mxu1 %vm223_vm0, %v215_v5  ;;  %p569_p13 = pnand %p568_p12, %p688_p4  ;;  %p574_p3 = por %p573_p2, %p572_p1 }
  0x20   : > { %p570_p0 = pneg %p569_p13 }
  0x22   : > { %p575_p5 = pnand %p574_p3, %p570_p0 }
  0x24   : > { %477 = vmatmul.msk.f32.gmra.mxu2 %vm223_vm0, %v218_v6  ;;  %479 = vmatmul.msk.f32.gmra.mxu3 %vm223_vm0, %v220_v7 }
  0x26   : > { %473 = vmatmul.msk.f32.gmra.mxu0 %vm223_vm0, %v214_v8  ;;  %475 = vmatmul.msk.f32.gmra.mxu1 %vm223_vm0, %v216_v9 }
  0x9b   : > { %v265_v16 = vpop.f32.mrf.mxu0  ;;  %v271_v17 = vpop.f32.mrf.mxu1 }
  0x9c   : > { %v325_v18 = vsel %vm317_vm1, 0.0, %v265_v16  ;;  %v327_v19 = vsel %vm319_vm2, 0.0, %v271_v17 }
  0x9d   : > { %334 = vst.msk [vmem:[%s722_s6] sm:$0xff] %vm333_vm3, %v325_v18 }
  0x9e   : > { %336 = vst.msk [vmem:[%s722_s6 + $0x10] sm:$0xff] %vm333_vm3, %v327_v19 }
  0x9f   : > { %v277_v22 = vpop.f32.mrf.mxu2  ;;  %v283_v23 = vpop.f32.mrf.mxu3 }
  0xa0   : > { %v329_v24 = vsel %vm321_vm4, 0.0, %v277_v22  ;;  %v331_v25 = vsel %vm323_vm5, 0.0, %v283_v23 }
  0xa1   : > { %338 = vst.msk [vmem:[%s722_s6 + $0x20] sm:$0xff] %vm333_vm3, %v329_v24 }
  0xa2   : > { %340 = vst.msk [vmem:[%s722_s6 + $0x30] sm:$0xff] %vm333_vm3, %v331_v25 }
  0xa3   : > { %v268_v28 = vpop.f32.mrf.mxu0  ;;  %v274_v29 = vpop.f32.mrf.mxu1 }
  0xa4   : > { %v326_v30 = vsel %vm318_vm6, 0.0, %v268_v28  ;;  %v328_v31 = vsel %vm320_vm7, 0.0, %v274_v29 }
  0xa5   : > { %335 = vst.msk [vmem:[%s722_s6 + $0x8] sm:$0xff] %vm333_vm3, %v326_v30 }
  0xa6   : > { %337 = vst.msk [vmem:[%s722_s6 + $0x18] sm:$0xff] %vm333_vm3, %v328_v31 }
  0xa7   : > { %v280_v32 = vpop.f32.mrf.mxu2  ;;  %v286_v33 = vpop.f32.mrf.mxu3 }
  0xa8   : > { %v330_v34 = vsel %vm322_vm8, 0.0, %v280_v32  ;;  %v332_v35 = vsel %vm324_vm9, 0.0, %v286_v33 }
  0xa9   : > { %339 = vst.msk [vmem:[%s722_s6 + $0x28] sm:$0xff] %vm333_vm3, %v330_v34 }
  0xaa   : > { %341 = vst.msk [vmem:[%s722_s6 + $0x38] sm:$0xff] %vm333_vm3, %v332_v35 }
  0xab   : > { %578 = shalt.err (!%p575_p5)
}
  0xac   : > { %s631_s30 = smov 128   ;;  %s632_s3 = smov 8  }
  0xad   : > { %494 = dma.vmem_to_hbm [thread:$0]  (%p688_p4), %s359_s12, 1024, %s361_s18, %s343_s20, %s631_s30, %s631_s30, %s632_s3  }
  0xae PF: > { %p500_p6 = scmp.ge.s32.totalorder %s629_s14, 2  ;;  %s375_s4 = sand.u32 1, %s609_s9  }
  0xaf   : > { %s376_s5 = scalar_lea.sflag [#allocation3], %s375_s4 }
  0xb0   : > { %p497_p7 = pnand %p500_p6, %p695_p8 }
  0xb2   : > { %p498_p9 = pneg %p497_p7 }
  0xb4   : > { %604 = dma.done.wait (%p498_p9), %s376_s5, 1024  }
  0xb5   : > { %606 = vsyncadd (%p498_p9), %s376_s5, 4294966272  ;;  %s15_s14 = sadd.s32 1, %s629_s14   ;;  %s784_s9 = smov %s613_s10 }
  0xb6   : > { %p12_p10 = scmp.ge.s32.totalorder %s15_s14, 4   ;;  %s785_s10 = smov %s617_s11 }
  0xb7   : > { %s786_s11 = smov %s701_s22  ;;  %s787_s12 = smov %s625_s13 }
  0xb8   : > { %s788_s13 = smov %s790_s17  ;;  %14 = sbr.rel (!%p12_p10) target bundleno = 4 (0x4), region = 74 }
  0xbd   :  { %382 = vsyncpa [#allocation3], 1 }
  0xbe   :  { %384 = vsyncpa [#allocation3 + $0x1], 1 }

// kernel: cocomg_forward.2
= control target key start
LH: loop header
LB: loop body
LE: loop exit
PB: predicated region body
PF: predicated region fallthrough
CT: control target
= control target key end

     0   :  { %s861_s24 = smov 0   ;;  %s863_s25 = smov 0   ;;  %s1023_s0 = inlined_call_operand.vmem [shape: f32[64,32], index: 0, kind: input, shape index: {}]   ;;  %s1024_s1 = inlined_call_operand.vmem [shape: f32[32,64], index: 1, kind: input, shape index: {}]   ;;  %s1025_s2 = inlined_call_operand.vmem [shape: f32[1,64], index: 2, kind: input, shape index: {}]   ;;  %s1026_s3 = inlined_call_operand.vmem [shape: f32[2,32,16], index: 3, kind: input, shape index: {}]   ;;  %s1027_s4 = inlined_call_operand.vmem [shape: f32[2,1,16], index: 4, kind: input, shape index: {}]   ;;  %s1028_s5 = inlined_call_operand.vmem [shape: f32[2,64,16], index: 5, kind: output, shape index: {0}]   ;;  %s1029_s6 = inlined_call_operand.vmem [shape: f32[2,64,16], index: 6, kind: output, shape index: {1}]   ;;  %s1030_s7 = inlined_call_operand.vmem [shape: f32[64,16], index: 7, kind: output, shape index: {2}]  }
   0x1   :  { %s865_s26 = smov 0  }
   0x2 LB: > { %s874_s27 = sadd.s32 4294967295, %s818_s26   ;;  %s876_s28 = sadd.s32 1, %s818_s26   ;;  %s818_s26 = sphi %s865_s26, %s1034_s26   ;;  %s814_s25 = sphi %s863_s25, %s1033_s25   ;;  %s810_s24 = sphi %s861_s24, %s1032_s24  }
   0x3   : > { %s132_s29 = ssub.s32 %s818_s26, %s876_s28  ;;  %s135_s30 = sadd.s32 1, %s814_s25 }
   0x4   : > { %p133_p0 = scmp.eq.s32.totalorder %s132_s29, 0  ;;  %p145_p1 = scmp.ne.s32.totalorder %s814_s25, %s810_s24 }
   0x5   : > { %p146_p2 = scmp.eq.s32.totalorder %s874_s27, 3  ;;  %p724_p3 = scmp.ge.s32.totalorder %s818_s26, 1 }
   0x6   : > { %s884_s8 = scalar_select %p133_p0, %s814_s25, %s135_s30  }
   0x7   : > { %p886_p4 = por %p146_p2, %p145_p1  ;;  %p243_p5 = scmp.lt.s32.totalorder %s818_s26, 5 }
   0x9   : > { %p244_p6 = pnand %p724_p3, %p243_p5 }
   0xa   : > { %s727_s14 = sshll.u32 (!%p244_p6), %s874_s27, 1  ;;  %s820_s30 = smov (!%p244_p6), 96  }
   0xb   : > { %247 = sbr.rel (%p244_p6) target bundleno = 559 (0x22f), region = 40  ;;  %p284_p7 = scmp.lt.s32.totalorder (!%p244_p6), %s727_s14, 7 }
   0xc   : > { %s267_s10 = sand.u32 (!%p244_p6), 1, %s810_s24  }
   0xd   : > { %s944_s11 = sshll.u32 (!%p244_p6), %s267_s10, 5 }
   0xe   : > { %s951_s15 = scalar_lea.vmem (!%p244_p6), [#allocation2], %s944_s11 }
  0x10   : > { %v302_v0 = vld [vmem:[%s1024_s1 + $0x18] sm:$0xff]  ;;  %v301_v1 = vld [vmem:[%s1024_s1 + $0x10] sm:$0xff]  ;;  %v300_v3 = vld [vmem:[%s1024_s1 + $0x8] sm:$0xff]  ;;  %s1036_s14 = smov (!%p284_p7, %s727_s14), 7  ;;  %vm307_vm0 = vcmask 261120   ;;  %vm376_vm1 = vcmask 130048  }
  0x11   : > { %326 = vmatpush.msra.mxu0 %v302_v0  ;;  %756 = vmatpush.msra.mxu3 %v302_v0  ;;  %v342_v2 = vld [vmem:[%s1026_s3 + $0x18] sm:$0xff]  ;;  %v299_v4 = vld [vmem:[%s1024_s1] sm:$0xff]  ;;  %s728_s21 = sshll.u32 %s1036_s14, 3  ;;  %v341_v7 = vld [vmem:[%s1026_s3 + $0x10] sm:$0xff]  ;;  %s982_s14 = scalar_lea.vmem [#allocation3], %s944_s11 }
  0x12   : > { %365 = vmatpush.msra.mxu1 %v342_v2  ;;  %s287_s26 = scalar_lea.vmem %s1023_s0, %s728_s21  ;;  %v340_v8 = vld [vmem:[%s1026_s3 + $0x8] sm:$0xff]  ;;  %v339_v9 = vld [vmem:[%s1026_s3] sm:$0xff]  ;;  %v738_v10 = vld [vmem:[%s1026_s3 + $0x38] sm:$0xff]  ;;  %s295_s19 = scalar_lea.vmem %s1030_s7, %s728_s21 }
  0x13   : > { %327 = vmatpush.msra.mxu0 %v301_v1  ;;  %757 = vmatpush.msra.mxu3 %v301_v1  ;;  %v297_v5 = vld [vmem:[%s287_s26] sm:$0xff]  ;;  %v298_v6 = vld [vmem:[%s287_s26 + $0x8] sm:$0xff]  ;;  %v737_v11 = vld [vmem:[%s1026_s3 + $0x30] sm:$0xff]  ;;  %s754_s21 = sshll.u32 (%p886_p4), %s874_s27, 4 }
  0x14   : > { %366 = vmatpush.msra.mxu1 %v341_v7  ;;  %445 = vmatpush.msra.mxu2 %v738_v10  ;;  %v736_v12 = vld [vmem:[%s1026_s3 + $0x28] sm:$0xff]  ;;  %v735_v13 = vld [vmem:[%s1026_s3 + $0x20] sm:$0xff]  ;;  %s516_s23 = scalar_lea.vmem (%p886_p4), %s1028_s5, %s754_s21 }
  0x15   : > { %328 = vmatpush.msra.mxu0 %v300_v3  ;;  %758 = vmatpush.msra.mxu3 %v300_v3  ;;  %v785_v14 = vld [vmem:[%s1025_s2] ss:$0 sm:$0xff]  ;;  %v787_v32 = vld [vmem:[%s1027_s4 + $0x1] ss:$0 sm:$0xff] }
  0x16   : > { %367 = vmatpush.msra.mxu1 %v340_v8  ;;  %446 = vmatpush.msra.mxu2 %v737_v11  ;;  %v786_v23 = vld [vmem:[%s1027_s4] ss:$0 sm:$0xff] }
  0x17   : > { %329 = vmatpush.msra.mxu0 %v299_v4  ;;  %759 = vmatpush.msra.mxu3 %v299_v4 }
  0x18   : > { %731 = vmatmul.msk.f32.vlgmr.msra.gmra.mxu0 %vm307_vm0, %v297_v5  ;;  %732 = vmatmul.msk.f32.vlgmr.msra.gmra.mxu3 %vm307_vm0, %v298_v6 }
  0x19   : > { %368 = vmatpush.msra.mxu1 %v339_v9  ;;  %447 = vmatpush.msra.mxu2 %v736_v12 }
  0x1b   : > { %448 = vmatpush.msra.mxu2 %v735_v13 }
  0x95   : > { %v331_v15 = vpop.f32.mrf.mxu0 }
  0x96   : > { %v332_v16 = vadd.f32 %v785_v14, %v331_v15 }
  0x98   : > { %v337_v17 = vmax.f32 %v332_v16, 0.0 }
  0x9a   : > { %425 = vrot.lane.b32.xlu0 %v337_v17, %s820_s30  ;;  %733 = vmatmul.msk.f32.vlgmr.msra.gmra.mxu1 %vm307_vm0, %v337_v17 }
  0x9b   : > { %v334_v18 = vpop.f32.mrf.mxu3 }
  0x9c   : > { %v335_v19 = vadd.f32 %v785_v14, %v334_v18 }
  0x9e   : > { %v338_v20 = vmax.f32 %v335_v19, 0.0 }
  0xa2   : > { %427 = vrot.lane.b32.xlu0 %v338_v20, %s820_s30  ;;  %734 = vmatmul.msk.f32.gmra.mxu1 %vm307_vm0, %v338_v20 }
 0x10c   : > { %v426_v21 = vpop.permute.xlu0 %425 }
 0x10d   : > { %740 = vmatmul.msk.f32.vlgmr.msra.gmra.mxu2 %vm307_vm0, %v426_v21 }
 0x114   : > { %v428_v22 = vpop.permute.xlu0 %427 }
 0x115   : > { %741 = vmatmul.msk.f32.gmra.mxu2 %vm307_vm0, %v428_v22 }
 0x117   : > { %v370_v24 = vpop.f32.mrf.mxu1 }
 0x118   : > { %v371_v25 = vadd.f32 %v786_v23, %v370_v24 }
 0x11a   : > { %377 = vst.msk [vmem:[%s951_s15] sm:$0xff] %vm376_vm1, %v371_v25  ;;  %v379_v26 = vmul.f32 %v371_v25, %v371_v25  ;;  %v411_v36 = vmul.f32 0.5, %v371_v25 }
 0x11c   : > { %v381_v27 = vsel %vm376_vm1, %v379_v26, 0.0 }
 0x11d   : > { %382 = vadd.xlane.f32.xlu1 %v381_v27 }
 0x11f   : > { %v373_v28 = vpop.f32.mrf.mxu1 }
 0x120   : > { %v374_v29 = vadd.f32 %v786_v23, %v373_v28 }
 0x121   : > { %v551_v19 = vld [vmem:[%s951_s15] sm:$0xff] (%p886_p4) }
 0x122   : > { %378 = vst.msk [vmem:[%s951_s15 + $0x8] sm:$0xff] %vm376_vm1, %v374_v29  ;;  %v380_v30 = vmul.f32 %v374_v29, %v374_v29  ;;  %v412_v47 = vmul.f32 0.5, %v374_v29 }
 0x123   : > { %552 = vst [vmem:[%s516_s23] sm:$0xff] (%p886_p4), %v551_v19 }
 0x124   : > { %v384_v31 = vsel %vm376_vm1, %v380_v30, 0.0 }
 0x125   : > { %385 = vadd.xlane.f32.xlu1 %v384_v31 }
 0x129   : > { %v553_v20 = vld [vmem:[%s951_s15 + $0x8] sm:$0xff] (%p886_p4) }
 0x12a   : > { %554 = vst [vmem:[%s516_s23 + $0x8] sm:$0xff] (%p886_p4), %v553_v20 }
 0x190   : > { %v450_v33 = vpop.f32.mrf.mxu2  ;;  %v383_v34 = vpop.xlane.xlu1 %382 }
 0x191   : > { %v962_v35 = vadd.f32 %v787_v32, %v450_v33  ;;  %788 = vrsqrt.f32 %v383_v34  ;;  %vm393_vm3 = vweird.f32 %v383_v34 }
 0x193   : > { %742 = vst.msk [vmem:[%s951_s15 + $0x10] sm:$0xff] %vm376_vm1, %v962_v35  ;;  %v492_v37 = vmul.f32 0.5, %v962_v35  ;;  %v459_v38 = vmul.f32 %v962_v35, %v962_v35 }
 0x195   : > { %v494_v39 = vadd.f32 %v492_v37, %v411_v36  ;;  %v461_v40 = vsel %vm376_vm1, %v459_v38, 0.0 }
 0x196   : > { %462 = vadd.xlane.f32.xlu2 %v461_v40 }
 0x197   : > { %v789_v41 = vpop.eup %788  ;;  %496 = vst.msk [vmem:[%s295_s19] sm:$0xff] %vm376_vm1, %v494_v39 }
 0x198   : > { %v388_v42 = vmul.f32 %v789_v41, %v383_v34  ;;  %v453_v43 = vpop.f32.mrf.mxu2  ;;  %v386_v44 = vpop.xlane.xlu1 %385  ;;  %vm394_vm2 = vweird.f32 %v789_v41 }
 0x199   : > { %v454_v45 = vadd.f32 %v787_v32, %v453_v43  ;;  %790 = vrsqrt.f32 %v386_v44  ;;  %vm395_vm4 = vmor %vm393_vm3, %vm394_vm2  ;;  %vm403_vm6 = vweird.f32 %v386_v44 }
 0x19a   : > { %v389_v46 = vmul.f32 %v789_v41, %v388_v42  ;;  %v555_v21 = vld [vmem:[%s951_s15 + $0x10] sm:$0xff] (%p886_p4) }
 0x19b   : > { %743 = vst.msk [vmem:[%s951_s15 + $0x18] sm:$0xff] %vm376_vm1, %v454_v45  ;;  %v493_v48 = vmul.f32 0.5, %v454_v45  ;;  %v460_v49 = vmul.f32 %v454_v45, %v454_v45 }
 0x19c   : > { %v390_v50 = vmul.f32 0.5, %v389_v46  ;;  %556 = vst [vmem:[%s516_s23 + $0x40] sm:$0xff] (%p886_p4), %v555_v21 }
 0x19d   : > { %v495_v51 = vadd.f32 %v493_v48, %v412_v47  ;;  %v464_v52 = vsel %vm376_vm1, %v460_v49, 0.0 }
 0x19e   : > { %v391_v53 = vsub.f32 1.5, %v390_v50  ;;  %465 = vadd.xlane.f32.xlu2 %v464_v52 }
 0x19f   : > { %v791_v54 = vpop.eup %790  ;;  %497 = vst.msk [vmem:[%s295_s19 + $0x8] sm:$0xff] %vm376_vm1, %v495_v51 }
 0x1a0   : > { %v392_v55 = vmul.f32 %v789_v41, %v391_v53  ;;  %v398_v56 = vmul.f32 %v791_v54, %v386_v44  ;;  %vm404_vm5 = vweird.f32 %v791_v54 }
 0x1a1   : > { %vm405_vm7 = vmor %vm403_vm6, %vm404_vm5 }
 0x1a2   : > { %v396_v57 = vsel %vm395_vm4, %v789_v41, %v392_v55  ;;  %v399_v58 = vmul.f32 %v791_v54, %v398_v56  ;;  %v557_v22 = vld [vmem:[%s951_s15 + $0x18] sm:$0xff] (%p886_p4) }
 0x1a3   : > { %v407_v59 = vmul.f32 %v396_v57, %v371_v25  ;;  %558 = vst [vmem:[%s516_s23 + $0x48] sm:$0xff] (%p886_p4), %v557_v22 }
 0x1a4   : > { %v400_v60 = vmul.f32 0.5, %v399_v58 }
 0x1a5   : > { %409 = vst.msk [vmem:[%s982_s14] sm:$0xff] %vm376_vm1, %v407_v59 }
 0x1a6   : > { %v401_v61 = vsub.f32 1.5, %v400_v60 }
 0x1a8   : > { %v402_v62 = vmul.f32 %v791_v54, %v401_v61 }
 0x1aa   : > { %v406_v63 = vsel %vm405_vm7, %v791_v54, %v402_v62 }
 0x1ab   : > { %v408_v0 = vmul.f32 %v406_v63, %v374_v29 }
 0x1ad   : > { %410 = vst.msk [vmem:[%s982_s14 + $0x8] sm:$0xff] %vm376_vm1, %v408_v0 }
 0x209   : > { %v463_v1 = vpop.xlane.xlu2 %462 }
 0x20a   : > { %792 = vrsqrt.f32 %v463_v1  ;;  %vm473_vm9 = vweird.f32 %v463_v1 }
 0x210   : > { %v793_v2 = vpop.eup %792 }
 0x211   : > { %v468_v3 = vmul.f32 %v793_v2, %v463_v1  ;;  %v466_v4 = vpop.xlane.xlu2 %465  ;;  %vm474_vm8 = vweird.f32 %v793_v2 }
 0x212   : > { %794 = vrsqrt.f32 %v466_v4  ;;  %vm475_vm10 = vmor %vm473_vm9, %vm474_vm8  ;;  %vm483_vm12 = vweird.f32 %v466_v4 }
 0x213   : > { %v469_v5 = vmul.f32 %v793_v2, %v468_v3 }
 0x215   : > { %v470_v6 = vmul.f32 0.5, %v469_v5 }
 0x217   : > { %v471_v7 = vsub.f32 1.5, %v470_v6 }
 0x218   : > { %v795_v8 = vpop.eup %794 }
 0x219   : > { %v472_v9 = vmul.f32 %v793_v2, %v471_v7  ;;  %v478_v10 = vmul.f32 %v795_v8, %v466_v4  ;;  %vm484_vm11 = vweird.f32 %v795_v8 }
 0x21a   : > { %vm485_vm13 = vmor %vm483_vm12, %vm484_vm11 }
 0x21b   : > { %v476_v11 = vsel %vm475_vm10, %v793_v2, %v472_v9  ;;  %v479_v12 = vmul.f32 %v795_v8, %v478_v10 }
 0x21c   : > { %v487_v13 = vmul.f32 %v476_v11, %v962_v35 }
 0x21d   : > { %v480_v14 = vmul.f32 0.5, %v479_v12 }
 0x21e   : > { %744 = vst.msk [vmem:[%s982_s14 + $0x10] sm:$0xff] %vm376_vm1, %v487_v13 }
 0x21f   : > { %v481_v15 = vsub.f32 1.5, %v480_v14 }
 0x221   : > { %v482_v16 = vmul.f32 %v795_v8, %v481_v15 }
 0x222   : > { %513 = sbr.rel (!%p886_p4) target bundleno = 551 (0x227), region = 44 }
 0x223   : > { %v486_v17 = vsel %vm485_vm13, %v795_v8, %v482_v16 }
 0x224   : > { %v488_v18 = vmul.f32 %v486_v17, %v454_v45 }
 0x226   : > { %745 = vst.msk [vmem:[%s982_s14 + $0x18] sm:$0xff] %vm376_vm1, %v488_v18 }
 0x227 PF: > { %564 = sbr.rel (!%p886_p4) target bundleno = 559 (0x22f), region = 82  ;;  %s755_s26 = sshll.u32 (%p886_p4), %s874_s27, 4  ;;  %v602_v23 = vld [vmem:[%s982_s14] sm:$0xff] (%p886_p4)  ;;  %v604_v24 = vld [vmem:[%s982_s14 + $0x8] sm:$0xff] (%p886_p4)  ;;  %v606_v25 = vld [vmem:[%s982_s14 + $0x10] sm:$0xff] (%p886_p4) }
 0x228   : > { %s567_s10 = scalar_lea.vmem (%p886_p4), %s1029_s6, %s755_s26 }
 0x229   : > { %603 = vst [vmem:[%s567_s10] sm:$0xff] (%p886_p4), %v602_v23 }
 0x22a   : > { %605 = vst [vmem:[%s567_s10 + $0x8] sm:$0xff] (%p886_p4), %v604_v24 }
 0x22b   : > { %607 = vst [vmem:[%s567_s10 + $0x40] sm:$0xff] (%p886_p4), %v606_v25 }
 0x22d   : > { %v608_v26 = vld [vmem:[%s982_s14 + $0x18] sm:$0xff] }
 0x22e   : > { %609 = vst [vmem:[%s567_s10 + $0x48] sm:$0xff] %v608_v26 }
 0x22f PF: > { %p15_p8 = scmp.ge.s32.totalorder %s876_s28, 6   ;;  %s1032_s24 = smov %s814_s25 }
 0x230   : > { %s1033_s25 = smov %s884_s8  ;;  %s1034_s26 = smov %s876_s28 }
 0x231   :  { %17 = sbr.rel (!%p15_p8) target bundleno = 2 (0x2), region = 174 }

// kernel: cocomg_forward.2
= control target key start
LH: loop header
LB: loop body
LE: loop exit
PB: predicated region body
PF: predicated region fallthrough
CT: control target
= control target key end

     0   :  { %s861_s24 = smov 0   ;;  %s863_s25 = smov 0   ;;  %s1023_s0 = inlined_call_operand.vmem [shape: f32[64,32], index: 0, kind: input, shape index: {}]   ;;  %s1024_s1 = inlined_call_operand.vmem [shape: f32[32,64], index: 1, kind: input, shape index: {}]   ;;  %s1025_s2 = inlined_call_operand.vmem [shape: f32[1,64], index: 2, kind: input, shape index: {}]   ;;  %s1026_s3 = inlined_call_operand.vmem [shape: f32[2,32,16], index: 3, kind: input, shape index: {}]   ;;  %s1027_s4 = inlined_call_operand.vmem [shape: f32[2,1,16], index: 4, kind: input, shape index: {}]   ;;  %s1028_s5 = inlined_call_operand.vmem [shape: f32[2,64,16], index: 5, kind: output, shape index: {0}]   ;;  %s1029_s6 = inlined_call_operand.vmem [shape: f32[2,64,16], index: 6, kind: output, shape index: {1}]   ;;  %s1030_s7 = inlined_call_operand.vmem [shape: f32[64,16], index: 7, kind: output, shape index: {2}]  }
   0x1   :  { %s865_s26 = smov 0  }
   0x2 LB: > { %s874_s27 = sadd.s32 4294967295, %s818_s26   ;;  %s876_s28 = sadd.s32 1, %s818_s26   ;;  %s818_s26 = sphi %s865_s26, %s1034_s26   ;;  %s814_s25 = sphi %s863_s25, %s1033_s25   ;;  %s810_s24 = sphi %s861_s24, %s1032_s24  }
   0x3   : > { %s132_s29 = ssub.s32 %s818_s26, %s876_s28  ;;  %s135_s30 = sadd.s32 1, %s814_s25 }
   0x4   : > { %p133_p0 = scmp.eq.s32.totalorder %s132_s29, 0  ;;  %p145_p1 = scmp.ne.s32.totalorder %s814_s25, %s810_s24 }
   0x5   : > { %p146_p2 = scmp.eq.s32.totalorder %s874_s27, 3  ;;  %p724_p3 = scmp.ge.s32.totalorder %s818_s26, 1 }
   0x6   : > { %s884_s8 = scalar_select %p133_p0, %s814_s25, %s135_s30  }
   0x7   : > { %p886_p4 = por %p146_p2, %p145_p1  ;;  %p243_p5 = scmp.lt.s32.totalorder %s818_s26, 5 }
   0x9   : > { %p244_p6 = pnand %p724_p3, %p243_p5 }
   0xa   : > { %s727_s14 = sshll.u32 (!%p244_p6), %s874_s27, 1  ;;  %s820_s30 = smov (!%p244_p6), 96  }
   0xb   : > { %247 = sbr.rel (%p244_p6) target bundleno = 559 (0x22f), region = 40  ;;  %p284_p7 = scmp.lt.s32.totalorder (!%p244_p6), %s727_s14, 7 }
   0xc   : > { %s267_s10 = sand.u32 (!%p244_p6), 1, %s810_s24  }
   0xd   : > { %s944_s11 = sshll.u32 (!%p244_p6), %s267_s10, 5 }
   0xe   : > { %s951_s15 = scalar_lea.vmem (!%p244_p6), [#allocation2], %s944_s11 }
  0x10   : > { %v302_v0 = vld [vmem:[%s1024_s1 + $0x18] sm:$0xff]  ;;  %v301_v1 = vld [vmem:[%s1024_s1 + $0x10] sm:$0xff]  ;;  %v300_v3 = vld [vmem:[%s1024_s1 + $0x8] sm:$0xff]  ;;  %s1036_s14 = smov (!%p284_p7, %s727_s14), 7  ;;  %vm307_vm0 = vcmask 261120   ;;  %vm376_vm1 = vcmask 130048  }
  0x11   : > { %326 = vmatpush.msra.mxu0 %v302_v0  ;;  %756 = vmatpush.msra.mxu3 %v302_v0  ;;  %v342_v2 = vld [vmem:[%s1026_s3 + $0x18] sm:$0xff]  ;;  %v299_v4 = vld [vmem:[%s1024_s1] sm:$0xff]  ;;  %s728_s21 = sshll.u32 %s1036_s14, 3  ;;  %v341_v7 = vld [vmem:[%s1026_s3 + $0x10] sm:$0xff]  ;;  %s982_s14 = scalar_lea.vmem [#allocation3], %s944_s11 }
  0x12   : > { %365 = vmatpush.msra.mxu1 %v342_v2  ;;  %s287_s26 = scalar_lea.vmem %s1023_s0, %s728_s21  ;;  %v340_v8 = vld [vmem:[%s1026_s3 + $0x8] sm:$0xff]  ;;  %v339_v9 = vld [vmem:[%s1026_s3] sm:$0xff]  ;;  %v738_v10 = vld [vmem:[%s1026_s3 + $0x38] sm:$0xff]  ;;  %s295_s19 = scalar_lea.vmem %s1030_s7, %s728_s21 }
  0x13   : > { %327 = vmatpush.msra.mxu0 %v301_v1  ;;  %757 = vmatpush.msra.mxu3 %v301_v1  ;;  %v297_v5 = vld [vmem:[%s287_s26] sm:$0xff]  ;;  %v298_v6 = vld [vmem:[%s287_s26 + $0x8] sm:$0xff]  ;;  %v737_v11 = vld [vmem:[%s1026_s3 + $0x30] sm:$0xff]  ;;  %s754_s21 = sshll.u32 (%p886_p4), %s874_s27, 4 }
  0x14   : > { %366 = vmatpush.msra.mxu1 %v341_v7  ;;  %445 = vmatpush.msra.mxu2 %v738_v10  ;;  %v736_v12 = vld [vmem:[%s1026_s3 + $0x28] sm:$0xff]  ;;  %v735_v13 = vld [vmem:[%s1026_s3 + $0x20] sm:$0xff]  ;;  %s516_s23 = scalar_lea.vmem (%p886_p4), %s1028_s5, %s754_s21 }
  0x15   : > { %328 = vmatpush.msra.mxu0 %v300_v3  ;;  %758 = vmatpush.msra.mxu3 %v300_v3  ;;  %v785_v14 = vld [vmem:[%s1025_s2] ss:$0 sm:$0xff]  ;;  %v787_v32 = vld [vmem:[%s1027_s4 + $0x1] ss:$0 sm:$0xff] }
  0x16   : > { %367 = vmatpush.msra.mxu1 %v340_v8  ;;  %446 = vmatpush.msra.mxu2 %v737_v11  ;;  %v786_v23 = vld [vmem:[%s1027_s4] ss:$0 sm:$0xff] }
  0x17   : > { %329 = vmatpush.msra.mxu0 %v299_v4  ;;  %759 = vmatpush.msra.mxu3 %v299_v4 }
  0x18   : > { %731 = vmatmul.msk.f32.vlgmr.msra.gmra.mxu0 %vm307_vm0, %v297_v5  ;;  %732 = vmatmul.msk.f32.vlgmr.msra.gmra.mxu3 %vm307_vm0, %v298_v6 }
  0x19   : > { %368 = vmatpush.msra.mxu1 %v339_v9  ;;  %447 = vmatpush.msra.mxu2 %v736_v12 }
  0x1b   : > { %448 = vmatpush.msra.mxu2 %v735_v13 }
  0x95   : > { %v331_v15 = vpop.f32.mrf.mxu0 }
  0x96   : > { %v332_v16 = vadd.f32 %v785_v14, %v331_v15 }
  0x98   : > { %v337_v17 = vmax.f32 %v332_v16, 0.0 }
  0x9a   : > { %425 = vrot.lane.b32.xlu0 %v337_v17, %s820_s30  ;;  %733 = vmatmul.msk.f32.vlgmr.msra.gmra.mxu1 %vm307_vm0, %v337_v17 }
  0x9b   : > { %v334_v18 = vpop.f32.mrf.mxu3 }
  0x9c   : > { %v335_v19 = vadd.f32 %v785_v14, %v334_v18 }
  0x9e   : > { %v338_v20 = vmax.f32 %v335_v19, 0.0 }
  0xa2   : > { %427 = vrot.lane.b32.xlu0 %v338_v20, %s820_s30  ;;  %734 = vmatmul.msk.f32.gmra.mxu1 %vm307_vm0, %v338_v20 }
 0x10c   : > { %v426_v21 = vpop.permute.xlu0 %425 }
 0x10d   : > { %740 = vmatmul.msk.f32.vlgmr.msra.gmra.mxu2 %vm307_vm0, %v426_v21 }
 0x114   : > { %v428_v22 = vpop.permute.xlu0 %427 }
 0x115   : > { %741 = vmatmul.msk.f32.gmra.mxu2 %vm307_vm0, %v428_v22 }
 0x117   : > { %v370_v24 = vpop.f32.mrf.mxu1 }
 0x118   : > { %v371_v25 = vadd.f32 %v786_v23, %v370_v24 }
 0x11a   : > { %377 = vst.msk [vmem:[%s951_s15] sm:$0xff] %vm376_vm1, %v371_v25  ;;  %v379_v26 = vmul.f32 %v371_v25, %v371_v25  ;;  %v411_v36 = vmul.f32 0.5, %v371_v25 }
 0x11c   : > { %v381_v27 = vsel %vm376_vm1, %v379_v26, 0.0 }
 0x11d   : > { %382 = vadd.xlane.f32.xlu1 %v381_v27 }
 0x11f   : > { %v373_v28 = vpop.f32.mrf.mxu1 }
 0x120   : > { %v374_v29 = vadd.f32 %v786_v23, %v373_v28 }
 0x121   : > { %v551_v19 = vld [vmem:[%s951_s15] sm:$0xff] (%p886_p4) }
 0x122   : > { %378 = vst.msk [vmem:[%s951_s15 + $0x8] sm:$0xff] %vm376_vm1, %v374_v29  ;;  %v380_v30 = vmul.f32 %v374_v29, %v374_v29  ;;  %v412_v47 = vmul.f32 0.5, %v374_v29 }
 0x123   : > { %552 = vst [vmem:[%s516_s23] sm:$0xff] (%p886_p4), %v551_v19 }
 0x124   : > { %v384_v31 = vsel %vm376_vm1, %v380_v30, 0.0 }
 0x125   : > { %385 = vadd.xlane.f32.xlu1 %v384_v31 }
 0x129   : > { %v553_v20 = vld [vmem:[%s951_s15 + $0x8] sm:$0xff] (%p886_p4) }
 0x12a   : > { %554 = vst [vmem:[%s516_s23 + $0x8] sm:$0xff] (%p886_p4), %v553_v20 }
 0x190   : > { %v450_v33 = vpop.f32.mrf.mxu2  ;;  %v383_v34 = vpop.xlane.xlu1 %382 }
 0x191   : > { %v962_v35 = vadd.f32 %v787_v32, %v450_v33  ;;  %788 = vrsqrt.f32 %v383_v34  ;;  %vm393_vm3 = vweird.f32 %v383_v34 }
 0x193   : > { %742 = vst.msk [vmem:[%s951_s15 + $0x10] sm:$0xff] %vm376_vm1, %v962_v35  ;;  %v492_v37 = vmul.f32 0.5, %v962_v35  ;;  %v459_v38 = vmul.f32 %v962_v35, %v962_v35 }
 0x195   : > { %v494_v39 = vadd.f32 %v492_v37, %v411_v36  ;;  %v461_v40 = vsel %vm376_vm1, %v459_v38, 0.0 }
 0x196   : > { %462 = vadd.xlane.f32.xlu2 %v461_v40 }
 0x197   : > { %v789_v41 = vpop.eup %788  ;;  %496 = vst.msk [vmem:[%s295_s19] sm:$0xff] %vm376_vm1, %v494_v39 }
 0x198   : > { %v388_v42 = vmul.f32 %v789_v41, %v383_v34  ;;  %v453_v43 = vpop.f32.mrf.mxu2  ;;  %v386_v44 = vpop.xlane.xlu1 %385  ;;  %vm394_vm2 = vweird.f32 %v789_v41 }
 0x199   : > { %v454_v45 = vadd.f32 %v787_v32, %v453_v43  ;;  %790 = vrsqrt.f32 %v386_v44  ;;  %vm395_vm4 = vmor %vm393_vm3, %vm394_vm2  ;;  %vm403_vm6 = vweird.f32 %v386_v44 }
 0x19a   : > { %v389_v46 = vmul.f32 %v789_v41, %v388_v42  ;;  %v555_v21 = vld [vmem:[%s951_s15 + $0x10] sm:$0xff] (%p886_p4) }
 0x19b   : > { %743 = vst.msk [vmem:[%s951_s15 + $0x18] sm:$0xff] %vm376_vm1, %v454_v45  ;;  %v493_v48 = vmul.f32 0.5, %v454_v45  ;;  %v460_v49 = vmul.f32 %v454_v45, %v454_v45 }
 0x19c   : > { %v390_v50 = vmul.f32 0.5, %v389_v46  ;;  %556 = vst [vmem:[%s516_s23 + $0x40] sm:$0xff] (%p886_p4), %v555_v21 }
 0x19d   : > { %v495_v51 = vadd.f32 %v493_v48, %v412_v47  ;;  %v464_v52 = vsel %vm376_vm1, %v460_v49, 0.0 }
 0x19e   : > { %v391_v53 = vsub.f32 1.5, %v390_v50  ;;  %465 = vadd.xlane.f32.xlu2 %v464_v52 }
 0x19f   : > { %v791_v54 = vpop.eup %790  ;;  %497 = vst.msk [vmem:[%s295_s19 + $0x8] sm:$0xff] %vm376_vm1, %v495_v51 }
 0x1a0   : > { %v392_v55 = vmul.f32 %v789_v41, %v391_v53  ;;  %v398_v56 = vmul.f32 %v791_v54, %v386_v44  ;;  %vm404_vm5 = vweird.f32 %v791_v54 }
 0x1a1   : > { %vm405_vm7 = vmor %vm403_vm6, %vm404_vm5 }
 0x1a2   : > { %v396_v57 = vsel %vm395_vm4, %v789_v41, %v392_v55  ;;  %v399_v58 = vmul.f32 %v791_v54, %v398_v56  ;;  %v557_v22 = vld [vmem:[%s951_s15 + $0x18] sm:$0xff] (%p886_p4) }
 0x1a3   : > { %v407_v59 = vmul.f32 %v396_v57, %v371_v25  ;;  %558 = vst [vmem:[%s516_s23 + $0x48] sm:$0xff] (%p886_p4), %v557_v22 }
 0x1a4   : > { %v400_v60 = vmul.f32 0.5, %v399_v58 }
 0x1a5   : > { %409 = vst.msk [vmem:[%s982_s14] sm:$0xff] %vm376_vm1, %v407_v59 }
 0x1a6   : > { %v401_v61 = vsub.f32 1.5, %v400_v60 }
 0x1a8   : > { %v402_v62 = vmul.f32 %v791_v54, %v401_v61 }
 0x1aa   : > { %v406_v63 = vsel %vm405_vm7, %v791_v54, %v402_v62 }
 0x1ab   : > { %v408_v0 = vmul.f32 %v406_v63, %v374_v29 }
 0x1ad   : > { %410 = vst.msk [vmem:[%s982_s14 + $0x8] sm:$0xff] %vm376_vm1, %v408_v0 }
 0x209   : > { %v463_v1 = vpop.xlane.xlu2 %462 }
 0x20a   : > { %792 = vrsqrt.f32 %v463_v1  ;;  %vm473_vm9 = vweird.f32 %v463_v1 }
 0x210   : > { %v793_v2 = vpop.eup %792 }
 0x211   : > { %v468_v3 = vmul.f32 %v793_v2, %v463_v1  ;;  %v466_v4 = vpop.xlane.xlu2 %465  ;;  %vm474_vm8 = vweird.f32 %v793_v2 }
 0x212   : > { %794 = vrsqrt.f32 %v466_v4  ;;  %vm475_vm10 = vmor %vm473_vm9, %vm474_vm8  ;;  %vm483_vm12 = vweird.f32 %v466_v4 }
 0x213   : > { %v469_v5 = vmul.f32 %v793_v2, %v468_v3 }
 0x215   : > { %v470_v6 = vmul.f32 0.5, %v469_v5 }
 0x217   : > { %v471_v7 = vsub.f32 1.5, %v470_v6 }
 0x218   : > { %v795_v8 = vpop.eup %794 }
 0x219   : > { %v472_v9 = vmul.f32 %v793_v2, %v471_v7  ;;  %v478_v10 = vmul.f32 %v795_v8, %v466_v4  ;;  %vm484_vm11 = vweird.f32 %v795_v8 }
 0x21a   : > { %vm485_vm13 = vmor %vm483_vm12, %vm484_vm11 }
 0x21b   : > { %v476_v11 = vsel %vm475_vm10, %v793_v2, %v472_v9  ;;  %v479_v12 = vmul.f32 %v795_v8, %v478_v10 }
 0x21c   : > { %v487_v13 = vmul.f32 %v476_v11, %v962_v35 }
 0x21d   : > { %v480_v14 = vmul.f32 0.5, %v479_v12 }
 0x21e   : > { %744 = vst.msk [vmem:[%s982_s14 + $0x10] sm:$0xff] %vm376_vm1, %v487_v13 }
 0x21f   : > { %v481_v15 = vsub.f32 1.5, %v480_v14 }
 0x221   : > { %v482_v16 = vmul.f32 %v795_v8, %v481_v15 }
 0x222   : > { %513 = sbr.rel (!%p886_p4) target bundleno = 551 (0x227), region = 44 }
 0x223   : > { %v486_v17 = vsel %vm485_vm13, %v795_v8, %v482_v16 }
 0x224   : > { %v488_v18 = vmul.f32 %v486_v17, %v454_v45 }
 0x226   : > { %745 = vst.msk [vmem:[%s982_s14 + $0x18] sm:$0xff] %vm376_vm1, %v488_v18 }
 0x227 PF: > { %564 = sbr.rel (!%p886_p4) target bundleno = 559 (0x22f), region = 82  ;;  %s755_s26 = sshll.u32 (%p886_p4), %s874_s27, 4  ;;  %v602_v23 = vld [vmem:[%s982_s14] sm:$0xff] (%p886_p4)  ;;  %v604_v24 = vld [vmem:[%s982_s14 + $0x8] sm:$0xff] (%p886_p4)  ;;  %v606_v25 = vld [vmem:[%s982_s14 + $0x10] sm:$0xff] (%p886_p4) }
 0x228   : > { %s567_s10 = scalar_lea.vmem (%p886_p4), %s1029_s6, %s755_s26 }
 0x229   : > { %603 = vst [vmem:[%s567_s10] sm:$0xff] (%p886_p4), %v602_v23 }
 0x22a   : > { %605 = vst [vmem:[%s567_s10 + $0x8] sm:$0xff] (%p886_p4), %v604_v24 }
 0x22b   : > { %607 = vst [vmem:[%s567_s10 + $0x40] sm:$0xff] (%p886_p4), %v606_v25 }
 0x22d   : > { %v608_v26 = vld [vmem:[%s982_s14 + $0x18] sm:$0xff] }
 0x22e   : > { %609 = vst [vmem:[%s567_s10 + $0x48] sm:$0xff] %v608_v26 }
 0x22f PF: > { %p15_p8 = scmp.ge.s32.totalorder %s876_s28, 6   ;;  %s1032_s24 = smov %s814_s25 }
 0x230   : > { %s1033_s25 = smov %s884_s8  ;;  %s1034_s26 = smov %s876_s28 }
 0x231   :  { %17 = sbr.rel (!%p15_p8) target bundleno = 2 (0x2), region = 174 }

// kernel: cocomg_forward.3
= control target key start
LH: loop header
LB: loop body
LE: loop exit
PB: predicated region body
PF: predicated region fallthrough
CT: control target
= control target key end

     0   :  { %7 = vsyncpa [#allocation3], 0  ;;  %s779_s0 = inlined_call_operand.vmem [shape: f32[2,64,16], index: 0, kind: input, shape index: {}]   ;;  %s780_s1 = inlined_call_operand.vmem [shape: f32[2,16,64], index: 1, kind: input, shape index: {}]   ;;  %s781_s2 = inlined_call_operand.hbm [shape: f32[2,64,64], index: 2, kind: output, shape index: {}]  }
   0x1   :  { %9 = vsyncpa [#allocation3 + $0x1], 0  ;;  %s648_s9 = smov 0   ;;  %s650_s10 = smov 0  }
   0x2   :  { %s652_s11 = smov 0   ;;  %s654_s12 = smov 0  }
   0x3   :  { %s656_s13 = smov 0   ;;  %s658_s14 = smov 0  }
   0x4 LB: > { %s462_s15 = sadd.s32 4294967295, %s629_s14   ;;  %s463_s16 = sadd.s32 4294967294, %s629_s14   ;;  %s629_s14 = sphi %s658_s14, %s15_s14   ;;  %s625_s13 = sphi %s656_s13, %s788_s13   ;;  %s621_s12 = sphi %s654_s12, %s787_s12   ;;  %s617_s11 = sphi %s652_s11, %s786_s11   ;;  %s613_s10 = sphi %s650_s10, %s785_s10   ;;  %s609_s9 = sphi %s648_s9, %s784_s9  }
   0x5   : > { %s34_s17 = sadd.s32 1, %s625_s13  ;;  %s101_s18 = sadd.s32 1, %s617_s11 }
   0x6   : > { %p36_p0 = scmp.ge.s32.totalorder %s34_s17, 2  ;;  %p111_p1 = scmp.ne.s32.totalorder %s617_s11, %s613_s10 }
   0x7   : > { %p112_p2 = scmp.eq.s32.totalorder %s462_s15, 1  ;;  %p117_p3 = scmp.ne.s32.totalorder %s613_s10, %s609_s9 }
   0x8   : > { %s790_s17 = smov (%p36_p0, %s34_s17), 0  ;;  %p118_p5 = scmp.eq.s32.totalorder %s463_s16, 1 }
   0x9   : > { %p688_p4 = por %p112_p2, %p111_p1  ;;  %s94_s20 = ssub.s32 %s625_s13, %s790_s17 }
   0xa   : > { %p466_p6 = scmp.ge.s32.totalorder %s629_s14, 1  ;;  %p99_p7 = scmp.eq.s32.totalorder %s94_s20, 0 }
   0xb   : > { %p695_p8 = por %p118_p5, %p117_p3  ;;  %p160_p9 = scmp.lt.s32.totalorder %s629_s14, 3 }
   0xc   : > { %s701_s22 = scalar_select %p99_p7, %s617_s11, %s101_s18  }
   0xd   : > { %p161_p10 = pnand %p466_p6, %p160_p9 }
   0xe   : > { %p195_p11 = scmp.lt.s32.totalorder (!%p161_p10), %s621_s12, 1  ;;  %s191_s4 = sand.u32 (!%p161_p10), 1, %s613_s10  }
   0xf   : > { %164 = sbr.rel (%p161_p10) target bundleno = 174 (0xae), region = 28  ;;  %s467_s5 = sshll.u32 (!%p161_p10), %s191_s4, 6 }
  0x10   : > { %s722_s6 = scalar_lea.vmem (!%p161_p10), [#allocation2], %s467_s5  ;;  %s487_s7 = sshll.u32 (!%p161_p10), %s621_s12, 6 }
  0x11   : > { %s357_s16 = scalar_lea.hbm (!%p161_p10), %s781_s2, %s487_s7  ;;  %s343_s20 = scalar_lea.sflag (!%p161_p10), [#allocation3], %s191_s4 }
  0x12   : > { %s360_s18 = sshll.u32 (!%p161_p10), %s357_s16, 4  ;;  %s571_s27 = scalar_lea.hbm (!%p161_p10), %s781_s2, 128  ;;  %s361_s18 = int_to_ptr.hbm [resolvable:$true] %s360_s18 }
  0x14   : > { %s196_s23 = scalar_select %p195_p11, %s621_s12, 1  ;;  %vm223_vm0 = vcmask 130048   ;;  %v306_v10 = vlaneseq  ;;  %vm333_vm3 = vcmask 523264  }
  0x15   : > { %s358_s12 = sshll.u32 %s722_s6, 4  ;;  %s359_s12 = int_to_ptr.vmem [resolvable:$true] %s358_s12 }
  0x16   : > { %s485_s24 = sshll.u32 %s196_s23, 6  ;;  %s486_s25 = sshll.u32 %s196_s23, 4  ;;  %v307_v11 = vshrl.u32 %v306_v10, 7  ;;  %v316_v12 = vand.u32 127, %v306_v10 }
  0x17   : > { %s202_s28 = scalar_lea.vmem %s779_s0, %s485_s24  ;;  %s211_s3 = scalar_lea.vmem %s780_s1, %s486_s25 }
  0x18   : > { %v222_v0 = vld [vmem:[%s211_s3 + $0x8] sm:$0xff]  ;;  %v221_v1 = vld [vmem:[%s211_s3] sm:$0xff]  ;;  %v219_v3 = vld [vmem:[%s202_s28 + $0x30] sm:$0xff]  ;;  %v309_v13 = vadd.s32 16, %v307_v11  ;;  %vm317_vm1 = vcmp.eq.s32.totalorder %v307_v11, %v316_v12  ;;  %v311_v14 = vadd.s32 32, %v307_v11  ;;  %v313_v15 = vadd.s32 48, %v307_v11 }
  0x19   : > { %489 = vmatpush.msra.mxu2 %v222_v0  ;;  %490 = vmatpush.msra.mxu3 %v222_v0  ;;  %v217_v2 = vld [vmem:[%s202_s28 + $0x20] sm:$0xff]  ;;  %v215_v5 = vld [vmem:[%s202_s28 + $0x10] sm:$0xff]  ;;  %v218_v6 = vld [vmem:[%s202_s28 + $0x28] sm:$0xff]  ;;  %v308_v20 = vadd.s32 8, %v307_v11  ;;  %v310_v21 = vadd.s32 24, %v307_v11  ;;  %v312_v26 = vadd.s32 40, %v307_v11 }
  0x1a   : > { %262 = vmatpush.msra.mxu0 %v222_v0  ;;  %488 = vmatpush.msra.mxu1 %v222_v0  ;;  %v213_v4 = vld [vmem:[%s202_s28] sm:$0xff]  ;;  %v220_v7 = vld [vmem:[%s202_s28 + $0x38] sm:$0xff]  ;;  %v214_v8 = vld [vmem:[%s202_s28 + $0x8] sm:$0xff]  ;;  %vm319_vm2 = vcmp.eq.s32.totalorder %v309_v13, %v316_v12  ;;  %vm321_vm4 = vcmp.eq.s32.totalorder %v311_v14, %v316_v12  ;;  %vm323_vm5 = vcmp.eq.s32.totalorder %v313_v15, %v316_v12  ;;  %v314_v27 = vadd.s32 56, %v307_v11  ;;  %s565_s23 = sshra.s32 %s361_s18, 4  ;;  %s566_s23 = int_to_ptr.hbm [resolvable:$true] %s565_s23 }
  0x1b   : > { %492 = vmatpush.msra.mxu2 %v221_v1  ;;  %493 = vmatpush.msra.mxu3 %v221_v1  ;;  %v216_v9 = vld [vmem:[%s202_s28 + $0x18] sm:$0xff]  ;;  %vm318_vm6 = vcmp.eq.s32.totalorder %v308_v20, %v316_v12  ;;  %vm320_vm7 = vcmp.eq.s32.totalorder %v310_v21, %v316_v12  ;;  %vm322_vm8 = vcmp.eq.s32.totalorder %v312_v26, %v316_v12  ;;  %s567_s24 = scalar_lea.hbm %s566_s23, 64  ;;  %p572_p1 = scmp.lt.s32.totalorder %s566_s23, %s781_s2 }
  0x1c   : > { %476 = vmatmul.msk.f32.vlgmr.msra.gmra.mxu2 %vm223_vm0, %v217_v2  ;;  %478 = vmatmul.msk.f32.vlgmr.msra.gmra.mxu3 %vm223_vm0, %v219_v3  ;;  %vm324_vm9 = vcmp.eq.s32.totalorder %v314_v27, %v316_v12  ;;  %p568_p12 = scmp.ne.s32.totalorder %s566_s23, %s567_s24  ;;  %p573_p2 = scmp.lt.s32.totalorder %s571_s27, %s567_s24 }
  0x1d   : > { %263 = vmatpush.msra.mxu0 %v221_v1  ;;  %491 = vmatpush.msra.mxu1 %v221_v1 }
  0x1e   : > { %472 = vmatmul.msk.f32.vlgmr.msra.gmra.mxu0 %vm223_vm0, %v213_v4  ;;  %474 = vmatmul.msk.f32.vlgmr.msra.gmra.mxu1 %vm223_vm0, %v215_v5  ;;  %p569_p13 = pnand %p568_p12, %p688_p4  ;;  %p574_p3 = por %p573_p2, %p572_p1 }
  0x20   : > { %p570_p0 = pneg %p569_p13 }
  0x22   : > { %p575_p5 = pnand %p574_p3, %p570_p0 }
  0x24   : > { %477 = vmatmul.msk.f32.gmra.mxu2 %vm223_vm0, %v218_v6  ;;  %479 = vmatmul.msk.f32.gmra.mxu3 %vm223_vm0, %v220_v7 }
  0x26   : > { %473 = vmatmul.msk.f32.gmra.mxu0 %vm223_vm0, %v214_v8  ;;  %475 = vmatmul.msk.f32.gmra.mxu1 %vm223_vm0, %v216_v9 }
  0x9b   : > { %v265_v16 = vpop.f32.mrf.mxu0  ;;  %v271_v17 = vpop.f32.mrf.mxu1 }
  0x9c   : > { %v325_v18 = vsel %vm317_vm1, 0.0, %v265_v16  ;;  %v327_v19 = vsel %vm319_vm2, 0.0, %v271_v17 }
  0x9d   : > { %334 = vst.msk [vmem:[%s722_s6] sm:$0xff] %vm333_vm3, %v325_v18 }
  0x9e   : > { %336 = vst.msk [vmem:[%s722_s6 + $0x10] sm:$0xff] %vm333_vm3, %v327_v19 }
  0x9f   : > { %v277_v22 = vpop.f32.mrf.mxu2  ;;  %v283_v23 = vpop.f32.mrf.mxu3 }
  0xa0   : > { %v329_v24 = vsel %vm321_vm4, 0.0, %v277_v22  ;;  %v331_v25 = vsel %vm323_vm5, 0.0, %v283_v23 }
  0xa1   : > { %338 = vst.msk [vmem:[%s722_s6 + $0x20] sm:$0xff] %vm333_vm3, %v329_v24 }
  0xa2   : > { %340 = vst.msk [vmem:[%s722_s6 + $0x30] sm:$0xff] %vm333_vm3, %v331_v25 }
  0xa3   : > { %v268_v28 = vpop.f32.mrf.mxu0  ;;  %v274_v29 = vpop.f32.mrf.mxu1 }
  0xa4   : > { %v326_v30 = vsel %vm318_vm6, 0.0, %v268_v28  ;;  %v328_v31 = vsel %vm320_vm7, 0.0, %v274_v29 }
  0xa5   : > { %335 = vst.msk [vmem:[%s722_s6 + $0x8] sm:$0xff] %vm333_vm3, %v326_v30 }
  0xa6   : > { %337 = vst.msk [vmem:[%s722_s6 + $0x18] sm:$0xff] %vm333_vm3, %v328_v31 }
  0xa7   : > { %v280_v32 = vpop.f32.mrf.mxu2  ;;  %v286_v33 = vpop.f32.mrf.mxu3 }
  0xa8   : > { %v330_v34 = vsel %vm322_vm8, 0.0, %v280_v32  ;;  %v332_v35 = vsel %vm324_vm9, 0.0, %v286_v33 }
  0xa9   : > { %339 = vst.msk [vmem:[%s722_s6 + $0x28] sm:$0xff] %vm333_vm3, %v330_v34 }
  0xaa   : > { %341 = vst.msk [vmem:[%s722_s6 + $0x38] sm:$0xff] %vm333_vm3, %v332_v35 }
  0xab   : > { %578 = shalt.err (!%p575_p5)
}
  0xac   : > { %s631_s30 = smov 128   ;;  %s632_s3 = smov 8  }
  0xad   : > { %494 = dma.vmem_to_hbm [thread:$0]  (%p688_p4), %s359_s12, 1024, %s361_s18, %s343_s20, %s631_s30, %s631_s30, %s632_s3  }
  0xae PF: > { %p500_p6 = scmp.ge.s32.totalorder %s629_s14, 2  ;;  %s375_s4 = sand.u32 1, %s609_s9  }
  0xaf   : > { %s376_s5 = scalar_lea.sflag [#allocation3], %s375_s4 }
  0xb0   : > { %p497_p7 = pnand %p500_p6, %p695_p8 }
  0xb2   : > { %p498_p9 = pneg %p497_p7 }
  0xb4   : > { %604 = dma.done.wait (%p498_p9), %s376_s5, 1024  }
  0xb5   : > { %606 = vsyncadd (%p498_p9), %s376_s5, 4294966272  ;;  %s15_s14 = sadd.s32 1, %s629_s14   ;;  %s784_s9 = smov %s613_s10 }
  0xb6   : > { %p12_p10 = scmp.ge.s32.totalorder %s15_s14, 4   ;;  %s785_s10 = smov %s617_s11 }
  0xb7   : > { %s786_s11 = smov %s701_s22  ;;  %s787_s12 = smov %s625_s13 }
  0xb8   : > { %s788_s13 = smov %s790_s17  ;;  %14 = sbr.rel (!%p12_p10) target bundleno = 4 (0x4), region = 74 }
  0xbd   :  { %382 = vsyncpa [#allocation3], 1 }
  0xbe   :  { %384 = vsyncpa [#allocation3 + $0x1], 1 }

</bundles_post_ra>
